<compile_context>
chip_gen: v5e
topology: v5e:2x2
jax: 0.10.0
libtpu: 0.0.40
codegen_flags: <defaults>
</compile_context>

<pallas_src>
import jax
import jax.numpy as jnp
from jax.experimental import pallas as pl
from jax.experimental.pallas import tpu as pltpu

FORWARD = "forward"
BACKWARD = "backward"

_LANE = 128
_SUBLANE = 8
_OUT_SLAB_BUDGET = 6 * 1024 * 1024  # bytes per (single-buffered) output block


def _round_up(x, m):
    return (x + m - 1) // m * m


def _ceil_div(a, b):
    return -(-a // b)


def _pad2(a, rows, cols):
    out = jnp.zeros((rows, cols), a.dtype)
    return out.at[: a.shape[0], : a.shape[1]].set(a)


# ---------------------------------------------------------------------------
# Pallas kernel: encoder + folded/lane-packed decoder over all steps
# ---------------------------------------------------------------------------
def _call_koopman_kernel(x_pad, enc_w, dec_w, n_steps, bt, per_pack):
    """x_pad: (Bp, NP) f32, Bp % bt == 0. Returns (n_steps+1, Bp, NP) f32."""
    Bp, Np = x_pad.shape
    n_out = n_steps + 1
    weights = list(enc_w) + list(dec_w)

    def kernel(x_ref,
               ew1, eb1, ew2, eb2, ew3, eb3,
               w1c, b1c, w2c, b2c, w3s, db3,
               out_ref):
        x = x_ref[...]                                                 # (bt, NP)

        # Encoder: tanh(fc1) -> tanh(fc2) -> fc3 (no tanh)
        h = jnp.tanh(jnp.dot(x, ew1[...],
                             preferred_element_type=jnp.float32) + eb1[...])
        h = jnp.tanh(jnp.dot(h, ew2[...],
                             preferred_element_type=jnp.float32) + eb2[...])
        z = jnp.dot(h, ew3[...],
                    preferred_element_type=jnp.float32) + eb3[...]    # (bt, BP)

        # Decoder: dynamics powers folded into fc1; layers 1-2 lane-packed
        # across step-slots (block-diagonal fc2); layer 3 per step.
        n_packs = w1c.shape[0]
        for p in range(n_packs):                                       # static
            h1 = jnp.tanh(jnp.dot(z, w1c[p],
                                  preferred_element_type=jnp.float32) + b1c[p])
            h2 = jnp.tanh(jnp.dot(h1, w2c[p],
                                  preferred_element_type=jnp.float32) + b2c[p])
            for j in range(per_pack):                                  # static
                s = p * per_pack + j
                if s >= n_out:
                    break
                out_ref[s] = jnp.tanh(
                    jnp.dot(h2, w3s[s],
                            preferred_element_type=jnp.float32) + db3[...]
                ).astype(out_ref.dtype)

    def _const_spec(arr):
        nd = arr.ndim
        return pl.BlockSpec(arr.shape, lambda i, _nd=nd: (0,) * _nd)

    in_specs = [pl.BlockSpec((bt, Np), lambda i: (i, 0))]
    in_specs += [_const_spec(w) for w in weights]

    return pl.pallas_call(
        kernel,
        out_shape=jax.ShapeDtypeStruct((n_out, Bp, Np), jnp.float32),
        grid=(Bp // bt,),
        in_specs=in_specs,
        out_specs=pl.BlockSpec((n_out, bt, Np), lambda i: (0, i, 0)),
        compiler_params=pltpu.CompilerParams(
            dimension_semantics=("parallel",),
            vmem_limit_bytes=64 * 1024 * 1024),
    )(x_pad, *weights)


# ---------------------------------------------------------------------------
# Parameter construction (mirrors the PyTorch __init__)
# ---------------------------------------------------------------------------
def _xavier_normal(key, fan_in, fan_out):
    std = jnp.sqrt(2.0 / (fan_in + fan_out))
    # stored as (in, out) == PyTorch weight.T
    return std * jax.random.normal(key, (fan_in, fan_out), jnp.float32)


def make_koopman_params(key, m, n, b, alpha=1, init_scale=1.0):
    N = m * n
    H = 16 * alpha
    keys = jax.random.split(key, 8)

    # EncoderNet: fc1(N->H), fc2(H->H), fc3(H->b); xavier_normal_, zero bias
    enc = (
        _xavier_normal(keys[0], N, H), jnp.zeros((1, H), jnp.float32),
        _xavier_normal(keys[1], H, H), jnp.zeros((1, H), jnp.float32),
        _xavier_normal(keys[2], H, b), jnp.zeros((1, b), jnp.float32),
    )
    # DecoderNet: fc1(b->H), fc2(H->H), fc3(H->N)
    dec = (
        _xavier_normal(keys[3], b, H), jnp.zeros((1, H), jnp.float32),
        _xavier_normal(keys[4], H, H), jnp.zeros((1, H), jnp.float32),
        _xavier_normal(keys[5], H, N), jnp.zeros((1, N), jnp.float32),
    )
    # Dynamics: gaussian_init_(b, std=1) -> Normal(0, 1/b), then W = U V^T * scale
    omega = (1.0 / b) * jax.random.normal(keys[6], (b, b), jnp.float32)
    U, _, Vh = jnp.linalg.svd(omega)
    K = (U @ Vh) * init_scale                    # PyTorch weight (out, in)
    # DynamicsBack: weight = pinverse(K.T)
    K_back = jnp.linalg.pinv(K.T)
    return enc, dec, K, K_back


# ---------------------------------------------------------------------------
# Module-equivalent wrapper
# ---------------------------------------------------------------------------
class KoopmanAEPallas:
    def __init__(self, m, n, b, steps, steps_back, alpha=1, init_scale=1.0,
                 key=None, batch_tile=1024):
        if key is None:
            key = jax.random.PRNGKey(0)
        self.m, self.n, self.b = m, n, b
        self.steps, self.steps_back = steps, steps_back
        self.batch_tile = batch_tile
        self.N = m * n
        self.H = 16 * alpha
        self.enc, self.dec, self.K, self.K_back = make_koopman_params(
            key, m, n, b, alpha, init_scale)

        # Padded / packed sizes (lane + MXU aligned).
        self.NP = _round_up(self.N, _LANE)
        self.HP = _round_up(self.H, _LANE)
        self.BP = _round_up(self.b, _LANE)
        self.per_pack = max(1, _LANE // self.H)            # step-slots per 128 lanes
        self.pack_lanes = _round_up(self.per_pack * self.H, _LANE)

        ew1, eb1, ew2, eb2, ew3, eb3 = self.enc
        self._enc_pad = (
            _pad2(ew1, self.NP, self.HP), _pad2(eb1, 1, self.HP),
            _pad2(ew2, self.HP, self.HP), _pad2(eb2, 1, self.HP),
            _pad2(ew3, self.HP, self.BP), _pad2(eb3, 1, self.BP),
        )
        # Folded + lane-packed decoder stacks (dynamics powers baked into fc1).
        self._dec_pack_fwd = self._build_packed_decoder(self.K.T, self.steps)
        self._dec_pack_bwd = self._build_packed_decoder(self.K_back.T,
                                                        self.steps_back)

    def _build_packed_decoder(self, dyn_mat, n_steps):
        dw1, db1, dw2, db2, dw3, db3 = self.dec
        b, H, N = self.b, self.H, self.N
        n_out = n_steps + 1
        per_pack, pack_lanes = self.per_pack, self.pack_lanes
        n_packs = _ceil_div(n_out, per_pack)

        # Dynamics powers applied as q -> q @ dyn_mat; last slot = I (decode(z)).
        # TODO(synk): for very long horizons / ill-conditioned trained K,
        # compute these powers in f64 (or fall back to sequential latents).
        powers = []
        acc = jnp.eye(b, dtype=jnp.float32)
        for _ in range(n_steps):
            acc = acc @ dyn_mat
            powers.append(acc)
        powers.append(jnp.eye(b, dtype=jnp.float32))

        w1c = jnp.zeros((n_packs, self.BP, pack_lanes), jnp.float32)
        b1c = jnp.zeros((n_packs, 1, pack_lanes), jnp.float32)
        w2c = jnp.zeros((n_packs, pack_lanes, pack_lanes), jnp.float32)
        b2c = jnp.zeros((n_packs, 1, pack_lanes), jnp.float32)
        w3s = jnp.zeros((n_out, pack_lanes, self.NP), jnp.float32)
        for s in range(n_out):
            p, j = divmod(s, per_pack)
            lo = j * H
            w1c = w1c.at[p, :b, lo:lo + H].set(powers[s] @ dw1)  # fold P_s
            b1c = b1c.at[p, 0, lo:lo + H].set(db1[0])
            w2c = w2c.at[p, lo:lo + H, lo:lo + H].set(dw2)       # block-diag fc2
            b2c = b2c.at[p, 0, lo:lo + H].set(db2[0])
            w3s = w3s.at[s, lo:lo + H, :N].set(dw3)
        db3p = _pad2(db3, 1, self.NP)
        return (w1c, b1c, w2c, b2c, w3s, db3p)

    def _choose_tiles(self, B, n_out):
        B8 = _round_up(max(B, 1), _SUBLANE)
        # Cap the tile so the (double-buffered) output slab stays VMEM-friendly
        # even for long horizons (v7x: 64 MiB physical).
        tile_cap = max(_SUBLANE,
                       (_OUT_SLAB_BUDGET // (n_out * self.NP * 4))
                       // _SUBLANE * _SUBLANE)
        eff_tile = max(_SUBLANE, min(self.batch_tile, tile_cap))
        n_tiles = max(1, _ceil_div(B8, eff_tile))
        # Megacore (v7x): make sure there are >= 2 grid programs when possible.
        if B8 >= 2 * _SUBLANE:
            n_tiles = max(n_tiles, 2)
        bt = _round_up(_ceil_div(B8, n_tiles), _SUBLANE)
        return bt, bt * n_tiles

    def __call__(self, x, mode=FORWARD):
        # x: any shape reshapable to (B, m*n); mirrors x.view(-1, 1, N)
        x_flat = jnp.reshape(x, (-1, self.N)).astype(jnp.float32)
        B = x_flat.shape[0]

        if mode == FORWARD:
            dec_pack, n_steps = self._dec_pack_fwd, self.steps
        else:
            dec_pack, n_steps = self._dec_pack_bwd, self.steps_back
        n_out = n_steps + 1

        bt, Bp = self._choose_tiles(B, n_out)
        x_pad = jnp.zeros((Bp, self.NP), jnp.float32).at[:B, :self.N].set(x_flat)

        slab = _call_koopman_kernel(x_pad, self._enc_pad, dec_pack,
                                    n_steps, bt, self.per_pack)

        # Single crop (skipped when nothing was padded) + reshape, then split
        # into the module's list-of-tensors interface.
        if B == Bp and self.N == self.NP:
            slab = slab.reshape(n_out, B, 1, self.m, self.n)
        else:
            slab = slab[:, :B, :self.N].reshape(n_out, B, 1, self.m, self.n)
        outs = [slab[i] for i in range(n_out)]
        if mode == FORWARD:
            return outs, []
        return [], outs


# ---------------------------------------------------------------------------
# Pure-JAX reference (sequential, unpadded — exact module semantics)
# ---------------------------------------------------------------------------
def _reference(x_flat, enc, dec, dyn_mat, n_steps):
    ew1, eb1, ew2, eb2, ew3, eb3 = enc
    dw1, db1, dw2, db2, dw3, db3 = dec
    h = jnp.tanh(x_flat @ ew1 + eb1)
    h = jnp.tanh(h @ ew2 + eb2)
    z = h @ ew3 + eb3

    def decode(q):
        d = jnp.tanh(q @ dw1 + db1)
        d = jnp.tanh(d @ dw2 + db2)
        return jnp.tanh(d @ dw3 + db3)

    outs = []
    q = z
    for _ in range(n_steps):
        q = q @ dyn_mat
        outs.append(decode(q))
    outs.append(decode(z))
    return jnp.stack(outs, axis=0)


if __name__ == "__main__":
    m, n, b = 16, 16, 8
    steps, steps_back = 4, 4
    alpha = 1
    batch = 2

    model = KoopmanAEPallas(m, n, b, steps, steps_back, alpha=alpha,
                            init_scale=1.0, key=jax.random.PRNGKey(0))
    x = jax.random.normal(jax.random.PRNGKey(1), (batch, 1, m, n), jnp.float32)

    # Forward mode
    out, out_back = model(x, mode=FORWARD)
    out = [jax.block_until_ready(o) for o in out]
    assert len(out) == steps + 1 and not out_back
    assert out[0].shape == (batch, 1, m, n)

    x_flat = jnp.reshape(x, (-1, m * n))
    ref_fwd = _reference(x_flat, model.enc, model.dec, model.K.T, steps)
    got_fwd = jnp.stack([jnp.reshape(o, (batch, m * n)) for o in out], axis=0)
    assert jnp.allclose(got_fwd, ref_fwd, atol=2e-5, rtol=1e-5), "forward mismatch"

    # Backward mode
    out2, out_back2 = model(x, mode=BACKWARD)
    out_back2 = [jax.block_until_ready(o) for o in out_back2]
    assert not out2 and len(out_back2) == steps_back + 1
    ref_bwd = _reference(x_flat, model.enc, model.dec, model.K_back.T, steps_back)
    got_bwd = jnp.stack([jnp.reshape(o, (batch, m * n)) for o in out_back2], axis=0)
    assert jnp.allclose(got_bwd, ref_bwd, atol=2e-5, rtol=1e-5), "backward mismatch"

    print("KERNEL_OK")
</pallas_src>

<mosaic_0001>
module attributes {stable_mosaic.version = 11 : i64} {
  func.func @kernel(%arg0: i32, %arg1: memref<8x256xf32, #tpu.memory_space<vmem>>, %arg2: memref<256x128xf32, #tpu.memory_space<vmem>>, %arg3: memref<1x128xf32, #tpu.memory_space<vmem>>, %arg4: memref<128x128xf32, #tpu.memory_space<vmem>>, %arg5: memref<1x128xf32, #tpu.memory_space<vmem>>, %arg6: memref<128x128xf32, #tpu.memory_space<vmem>>, %arg7: memref<1x128xf32, #tpu.memory_space<vmem>>, %arg8: memref<1x128x128xf32, #tpu.memory_space<vmem>>, %arg9: memref<1x1x128xf32, #tpu.memory_space<vmem>>, %arg10: memref<1x128x128xf32, #tpu.memory_space<vmem>>, %arg11: memref<1x1x128xf32, #tpu.memory_space<vmem>>, %arg12: memref<5x128x256xf32, #tpu.memory_space<vmem>>, %arg13: memref<1x256xf32, #tpu.memory_space<vmem>>, %arg14: memref<5x8x256xf32, #tpu.memory_space<vmem>>) attributes {dimension_semantics = [#tpu.dimension_semantics<parallel>], iteration_bounds = array<i64: 1>, scalar_prefetch = 0 : i64, scratch_operands = 0 : i64, tpu.core_type = #tpu.core_type<tc>, window_params = [{transform_indices = @transform_0, window_bounds = array<i64: 8, 256>}, {pipeline_mode = #tpu.pipeline_mode<synchronous>, transform_indices = @transform_1, window_bounds = array<i64: 256, 128>}, {pipeline_mode = #tpu.pipeline_mode<synchronous>, transform_indices = @transform_2, window_bounds = array<i64: 1, 128>}, {pipeline_mode = #tpu.pipeline_mode<synchronous>, transform_indices = @transform_3, window_bounds = array<i64: 128, 128>}, {pipeline_mode = #tpu.pipeline_mode<synchronous>, transform_indices = @transform_4, window_bounds = array<i64: 1, 128>}, {pipeline_mode = #tpu.pipeline_mode<synchronous>, transform_indices = @transform_5, window_bounds = array<i64: 128, 128>}, {pipeline_mode = #tpu.pipeline_mode<synchronous>, transform_indices = @transform_6, window_bounds = array<i64: 1, 128>}, {pipeline_mode = #tpu.pipeline_mode<synchronous>, transform_indices = @transform_7, window_bounds = array<i64: 1, 128, 128>}, {pipeline_mode = #tpu.pipeline_mode<synchronous>, transform_indices = @transform_8, window_bounds = array<i64: 1, 1, 128>}, {pipeline_mode = #tpu.pipeline_mode<synchronous>, transform_indices = @transform_9, window_bounds = array<i64: 1, 128, 128>}, {pipeline_mode = #tpu.pipeline_mode<synchronous>, transform_indices = @transform_10, window_bounds = array<i64: 1, 1, 128>}, {pipeline_mode = #tpu.pipeline_mode<synchronous>, transform_indices = @transform_11, window_bounds = array<i64: 5, 128, 256>}, {pipeline_mode = #tpu.pipeline_mode<synchronous>, transform_indices = @transform_12, window_bounds = array<i64: 1, 256>}, {transform_indices = @transform_13, window_bounds = array<i64: 5, 8, 256>}]} {
    %c0 = arith.constant 0 : index
    %c0_0 = arith.constant 0 : index
    %0 = vector.load %arg1[%c0, %c0_0] : memref<8x256xf32, #tpu.memory_space<vmem>>, vector<8x256xf32>
    %c0_1 = arith.constant 0 : index
    %c0_2 = arith.constant 0 : index
    %1 = vector.load %arg2[%c0_1, %c0_2] : memref<256x128xf32, #tpu.memory_space<vmem>>, vector<256x128xf32>
    %cst = arith.constant dense<0.000000e+00> : vector<8x128xf32>
    %2 = tpu.matmul %0, %1, %cst {dimension_numbers = #tpu.dot_dimension_numbers<[1], [0], [0], [1], [0, 0, 1, 1], [], []>} : vector<8x256xf32>, vector<256x128xf32>, vector<8x128xf32> -> vector<8x128xf32>
    %c0_3 = arith.constant 0 : index
    %c0_4 = arith.constant 0 : index
    %3 = vector.load %arg3[%c0_3, %c0_4] : memref<1x128xf32, #tpu.memory_space<vmem>>, vector<1x128xf32>
    %4 = vector.broadcast %3 : vector<1x128xf32> to vector<8x128xf32>
    %5 = arith.addf %2, %4 : vector<8x128xf32>
    %6 = math.tanh %5 : vector<8x128xf32>
    %c0_5 = arith.constant 0 : index
    %c0_6 = arith.constant 0 : index
    %7 = vector.load %arg4[%c0_5, %c0_6] : memref<128x128xf32, #tpu.memory_space<vmem>>, vector<128x128xf32>
    %cst_7 = arith.constant dense<0.000000e+00> : vector<8x128xf32>
    %8 = tpu.matmul %6, %7, %cst_7 {dimension_numbers = #tpu.dot_dimension_numbers<[1], [0], [0], [1], [0, 0, 1, 1], [], []>} : vector<8x128xf32>, vector<128x128xf32>, vector<8x128xf32> -> vector<8x128xf32>
    %c0_8 = arith.constant 0 : index
    %c0_9 = arith.constant 0 : index
    %9 = vector.load %arg5[%c0_8, %c0_9] : memref<1x128xf32, #tpu.memory_space<vmem>>, vector<1x128xf32>
    %10 = vector.broadcast %9 : vector<1x128xf32> to vector<8x128xf32>
    %11 = arith.addf %8, %10 : vector<8x128xf32>
    %12 = math.tanh %11 : vector<8x128xf32>
    %c0_10 = arith.constant 0 : index
    %c0_11 = arith.constant 0 : index
    %13 = vector.load %arg6[%c0_10, %c0_11] : memref<128x128xf32, #tpu.memory_space<vmem>>, vector<128x128xf32>
    %cst_12 = arith.constant dense<0.000000e+00> : vector<8x128xf32>
    %14 = tpu.matmul %12, %13, %cst_12 {dimension_numbers = #tpu.dot_dimension_numbers<[1], [0], [0], [1], [0, 0, 1, 1], [], []>} : vector<8x128xf32>, vector<128x128xf32>, vector<8x128xf32> -> vector<8x128xf32>
    %c0_13 = arith.constant 0 : index
    %c0_14 = arith.constant 0 : index
    %15 = vector.load %arg7[%c0_13, %c0_14] : memref<1x128xf32, #tpu.memory_space<vmem>>, vector<1x128xf32>
    %16 = vector.broadcast %15 : vector<1x128xf32> to vector<8x128xf32>
    %17 = arith.addf %14, %16 : vector<8x128xf32>
    %c0_15 = arith.constant 0 : index
    %c0_16 = arith.constant 0 : index
    %c0_17 = arith.constant 0 : index
    %18 = vector.load %arg8[%c0_15, %c0_16, %c0_17] : memref<1x128x128xf32, #tpu.memory_space<vmem>>, vector<1x128x128xf32>
    %19 = vector.shape_cast %18 : vector<1x128x128xf32> to vector<128x128xf32>
    %cst_18 = arith.constant dense<0.000000e+00> : vector<8x128xf32>
    %20 = tpu.matmul %17, %19, %cst_18 {dimension_numbers = #tpu.dot_dimension_numbers<[1], [0], [0], [1], [0, 0, 1, 1], [], []>} : vector<8x128xf32>, vector<128x128xf32>, vector<8x128xf32> -> vector<8x128xf32>
    %c0_19 = arith.constant 0 : index
    %c0_20 = arith.constant 0 : index
    %c0_21 = arith.constant 0 : index
    %21 = vector.load %arg9[%c0_19, %c0_20, %c0_21] : memref<1x1x128xf32, #tpu.memory_space<vmem>>, vector<1x1x128xf32>
    %22 = vector.shape_cast %21 : vector<1x1x128xf32> to vector<1x128xf32>
    %23 = vector.broadcast %22 : vector<1x128xf32> to vector<8x128xf32>
    %24 = arith.addf %20, %23 : vector<8x128xf32>
    %25 = math.tanh %24 : vector<8x128xf32>
    %c0_22 = arith.constant 0 : index
    %c0_23 = arith.constant 0 : index
    %c0_24 = arith.constant 0 : index
    %26 = vector.load %arg10[%c0_22, %c0_23, %c0_24] : memref<1x128x128xf32, #tpu.memory_space<vmem>>, vector<1x128x128xf32>
    %27 = vector.shape_cast %26 : vector<1x128x128xf32> to vector<128x128xf32>
    %cst_25 = arith.constant dense<0.000000e+00> : vector<8x128xf32>
    %28 = tpu.matmul %25, %27, %cst_25 {dimension_numbers = #tpu.dot_dimension_numbers<[1], [0], [0], [1], [0, 0, 1, 1], [], []>} : vector<8x128xf32>, vector<128x128xf32>, vector<8x128xf32> -> vector<8x128xf32>
    %c0_26 = arith.constant 0 : index
    %c0_27 = arith.constant 0 : index
    %c0_28 = arith.constant 0 : index
    %29 = vector.load %arg11[%c0_26, %c0_27, %c0_28] : memref<1x1x128xf32, #tpu.memory_space<vmem>>, vector<1x1x128xf32>
    %30 = vector.shape_cast %29 : vector<1x1x128xf32> to vector<1x128xf32>
    %31 = vector.broadcast %30 : vector<1x128xf32> to vector<8x128xf32>
    %32 = arith.addf %28, %31 : vector<8x128xf32>
    %33 = math.tanh %32 : vector<8x128xf32>
    %c0_29 = arith.constant 0 : index
    %c0_30 = arith.constant 0 : index
    %c0_31 = arith.constant 0 : index
    %34 = vector.load %arg12[%c0_29, %c0_30, %c0_31] : memref<5x128x256xf32, #tpu.memory_space<vmem>>, vector<1x128x256xf32>
    %35 = vector.shape_cast %34 : vector<1x128x256xf32> to vector<128x256xf32>
    %cst_32 = arith.constant dense<0.000000e+00> : vector<8x256xf32>
    %36 = tpu.matmul %33, %35, %cst_32 {dimension_numbers = #tpu.dot_dimension_numbers<[1], [0], [0], [1], [0, 0, 1, 1], [], []>} : vector<8x128xf32>, vector<128x256xf32>, vector<8x256xf32> -> vector<8x256xf32>
    %c0_33 = arith.constant 0 : index
    %c0_34 = arith.constant 0 : index
    %37 = vector.load %arg13[%c0_33, %c0_34] : memref<1x256xf32, #tpu.memory_space<vmem>>, vector<1x256xf32>
    %38 = vector.broadcast %37 : vector<1x256xf32> to vector<8x256xf32>
    %39 = arith.addf %36, %38 : vector<8x256xf32>
    %40 = math.tanh %39 : vector<8x256xf32>
    %c0_35 = arith.constant 0 : index
    %c0_36 = arith.constant 0 : index
    %c0_37 = arith.constant 0 : index
    %41 = vector.load %arg14[%c0_35, %c0_36, %c0_37] : memref<5x8x256xf32, #tpu.memory_space<vmem>>, vector<1x8x256xf32>
    %42 = vector.shape_cast %41 : vector<1x8x256xf32> to vector<8x256xf32>
    %43 = vector.shape_cast %40 : vector<8x256xf32> to vector<1x8x256xf32>
    tpu.vector_store %arg14[%c0_35, %c0_36, %c0_37], %43 {strides = array<i32>} : memref<5x8x256xf32, #tpu.memory_space<vmem>>, vector<1x8x256xf32>,
    %c1 = arith.constant 1 : index
    %c0_38 = arith.constant 0 : index
    %c0_39 = arith.constant 0 : index
    %44 = vector.load %arg12[%c1, %c0_38, %c0_39] : memref<5x128x256xf32, #tpu.memory_space<vmem>>, vector<1x128x256xf32>
    %45 = vector.shape_cast %44 : vector<1x128x256xf32> to vector<128x256xf32>
    %cst_40 = arith.constant dense<0.000000e+00> : vector<8x256xf32>
    %46 = tpu.matmul %33, %45, %cst_40 {dimension_numbers = #tpu.dot_dimension_numbers<[1], [0], [0], [1], [0, 0, 1, 1], [], []>} : vector<8x128xf32>, vector<128x256xf32>, vector<8x256xf32> -> vector<8x256xf32>
    %c0_41 = arith.constant 0 : index
    %c0_42 = arith.constant 0 : index
    %47 = vector.load %arg13[%c0_41, %c0_42] : memref<1x256xf32, #tpu.memory_space<vmem>>, vector<1x256xf32>
    %48 = vector.broadcast %47 : vector<1x256xf32> to vector<8x256xf32>
    %49 = arith.addf %46, %48 : vector<8x256xf32>
    %50 = math.tanh %49 : vector<8x256xf32>
    %c1_43 = arith.constant 1 : index
    %c0_44 = arith.constant 0 : index
    %c0_45 = arith.constant 0 : index
    %51 = vector.load %arg14[%c1_43, %c0_44, %c0_45] : memref<5x8x256xf32, #tpu.memory_space<vmem>>, vector<1x8x256xf32>
    %52 = vector.shape_cast %51 : vector<1x8x256xf32> to vector<8x256xf32>
    %53 = vector.shape_cast %50 : vector<8x256xf32> to vector<1x8x256xf32>
    tpu.vector_store %arg14[%c1_43, %c0_44, %c0_45], %53 {strides = array<i32>} : memref<5x8x256xf32, #tpu.memory_space<vmem>>, vector<1x8x256xf32>,
    %c2 = arith.constant 2 : index
    %c0_46 = arith.constant 0 : index
    %c0_47 = arith.constant 0 : index
    %54 = vector.load %arg12[%c2, %c0_46, %c0_47] : memref<5x128x256xf32, #tpu.memory_space<vmem>>, vector<1x128x256xf32>
    %55 = vector.shape_cast %54 : vector<1x128x256xf32> to vector<128x256xf32>
    %cst_48 = arith.constant dense<0.000000e+00> : vector<8x256xf32>
    %56 = tpu.matmul %33, %55, %cst_48 {dimension_numbers = #tpu.dot_dimension_numbers<[1], [0], [0], [1], [0, 0, 1, 1], [], []>} : vector<8x128xf32>, vector<128x256xf32>, vector<8x256xf32> -> vector<8x256xf32>
    %c0_49 = arith.constant 0 : index
    %c0_50 = arith.constant 0 : index
    %57 = vector.load %arg13[%c0_49, %c0_50] : memref<1x256xf32, #tpu.memory_space<vmem>>, vector<1x256xf32>
    %58 = vector.broadcast %57 : vector<1x256xf32> to vector<8x256xf32>
    %59 = arith.addf %56, %58 : vector<8x256xf32>
    %60 = math.tanh %59 : vector<8x256xf32>
    %c2_51 = arith.constant 2 : index
    %c0_52 = arith.constant 0 : index
    %c0_53 = arith.constant 0 : index
    %61 = vector.load %arg14[%c2_51, %c0_52, %c0_53] : memref<5x8x256xf32, #tpu.memory_space<vmem>>, vector<1x8x256xf32>
    %62 = vector.shape_cast %61 : vector<1x8x256xf32> to vector<8x256xf32>
    %63 = vector.shape_cast %60 : vector<8x256xf32> to vector<1x8x256xf32>
    tpu.vector_store %arg14[%c2_51, %c0_52, %c0_53], %63 {strides = array<i32>} : memref<5x8x256xf32, #tpu.memory_space<vmem>>, vector<1x8x256xf32>,
    %c3 = arith.constant 3 : index
    %c0_54 = arith.constant 0 : index
    %c0_55 = arith.constant 0 : index
    %64 = vector.load %arg12[%c3, %c0_54, %c0_55] : memref<5x128x256xf32, #tpu.memory_space<vmem>>, vector<1x128x256xf32>
    %65 = vector.shape_cast %64 : vector<1x128x256xf32> to vector<128x256xf32>
    %cst_56 = arith.constant dense<0.000000e+00> : vector<8x256xf32>
    %66 = tpu.matmul %33, %65, %cst_56 {dimension_numbers = #tpu.dot_dimension_numbers<[1], [0], [0], [1], [0, 0, 1, 1], [], []>} : vector<8x128xf32>, vector<128x256xf32>, vector<8x256xf32> -> vector<8x256xf32>
    %c0_57 = arith.constant 0 : index
    %c0_58 = arith.constant 0 : index
    %67 = vector.load %arg13[%c0_57, %c0_58] : memref<1x256xf32, #tpu.memory_space<vmem>>, vector<1x256xf32>
    %68 = vector.broadcast %67 : vector<1x256xf32> to vector<8x256xf32>
    %69 = arith.addf %66, %68 : vector<8x256xf32>
    %70 = math.tanh %69 : vector<8x256xf32>
    %c3_59 = arith.constant 3 : index
    %c0_60 = arith.constant 0 : index
    %c0_61 = arith.constant 0 : index
    %71 = vector.load %arg14[%c3_59, %c0_60, %c0_61] : memref<5x8x256xf32, #tpu.memory_space<vmem>>, vector<1x8x256xf32>
    %72 = vector.shape_cast %71 : vector<1x8x256xf32> to vector<8x256xf32>
    %73 = vector.shape_cast %70 : vector<8x256xf32> to vector<1x8x256xf32>
    tpu.vector_store %arg14[%c3_59, %c0_60, %c0_61], %73 {strides = array<i32>} : memref<5x8x256xf32, #tpu.memory_space<vmem>>, vector<1x8x256xf32>,
    %c4 = arith.constant 4 : index
    %c0_62 = arith.constant 0 : index
    %c0_63 = arith.constant 0 : index
    %74 = vector.load %arg12[%c4, %c0_62, %c0_63] : memref<5x128x256xf32, #tpu.memory_space<vmem>>, vector<1x128x256xf32>
    %75 = vector.shape_cast %74 : vector<1x128x256xf32> to vector<128x256xf32>
    %cst_64 = arith.constant dense<0.000000e+00> : vector<8x256xf32>
    %76 = tpu.matmul %33, %75, %cst_64 {dimension_numbers = #tpu.dot_dimension_numbers<[1], [0], [0], [1], [0, 0, 1, 1], [], []>} : vector<8x128xf32>, vector<128x256xf32>, vector<8x256xf32> -> vector<8x256xf32>
    %c0_65 = arith.constant 0 : index
    %c0_66 = arith.constant 0 : index
    %77 = vector.load %arg13[%c0_65, %c0_66] : memref<1x256xf32, #tpu.memory_space<vmem>>, vector<1x256xf32>
    %78 = vector.broadcast %77 : vector<1x256xf32> to vector<8x256xf32>
    %79 = arith.addf %76, %78 : vector<8x256xf32>
    %80 = math.tanh %79 : vector<8x256xf32>
    %c4_67 = arith.constant 4 : index
    %c0_68 = arith.constant 0 : index
    %c0_69 = arith.constant 0 : index
    %81 = vector.load %arg14[%c4_67, %c0_68, %c0_69] : memref<5x8x256xf32, #tpu.memory_space<vmem>>, vector<1x8x256xf32>
    %82 = vector.shape_cast %81 : vector<1x8x256xf32> to vector<8x256xf32>
    %83 = vector.shape_cast %80 : vector<8x256xf32> to vector<1x8x256xf32>
    tpu.vector_store %arg14[%c4_67, %c0_68, %c0_69], %83 {strides = array<i32>} : memref<5x8x256xf32, #tpu.memory_space<vmem>>, vector<1x8x256xf32>,
    return
  }
  func.func @transform_0(%arg0: i32) -> (i32, i32) {
    %c0_i32 = arith.constant 0 : i32
    %c0_i32_0 = arith.constant 0 : i32
    return %arg0, %c0_i32 : i32, i32
  }
  func.func @transform_1(%arg0: i32) -> (i32, i32) {
    %c0_i32 = arith.constant 0 : i32
    %c0_i32_0 = arith.constant 0 : i32
    %c0_i32_1 = arith.constant 0 : i32
    return %c0_i32, %c0_i32_0 : i32, i32
  }
  func.func @transform_2(%arg0: i32) -> (i32, i32) {
    %c0_i32 = arith.constant 0 : i32
    %c0_i32_0 = arith.constant 0 : i32
    %c0_i32_1 = arith.constant 0 : i32
    return %c0_i32, %c0_i32_0 : i32, i32
  }
  func.func @transform_3(%arg0: i32) -> (i32, i32) {
    %c0_i32 = arith.constant 0 : i32
    %c0_i32_0 = arith.constant 0 : i32
    %c0_i32_1 = arith.constant 0 : i32
    return %c0_i32, %c0_i32_0 : i32, i32
  }
  func.func @transform_4(%arg0: i32) -> (i32, i32) {
    %c0_i32 = arith.constant 0 : i32
    %c0_i32_0 = arith.constant 0 : i32
    %c0_i32_1 = arith.constant 0 : i32
    return %c0_i32, %c0_i32_0 : i32, i32
  }
  func.func @transform_5(%arg0: i32) -> (i32, i32) {
    %c0_i32 = arith.constant 0 : i32
    %c0_i32_0 = arith.constant 0 : i32
    %c0_i32_1 = arith.constant 0 : i32
    return %c0_i32, %c0_i32_0 : i32, i32
  }
  func.func @transform_6(%arg0: i32) -> (i32, i32) {
    %c0_i32 = arith.constant 0 : i32
    %c0_i32_0 = arith.constant 0 : i32
    %c0_i32_1 = arith.constant 0 : i32
    return %c0_i32, %c0_i32_0 : i32, i32
  }
  func.func @transform_7(%arg0: i32) -> (i32, i32, i32) {
    %c0_i32 = arith.constant 0 : i32
    %c0_i32_0 = arith.constant 0 : i32
    %c0_i32_1 = arith.constant 0 : i32
    %c0_i32_2 = arith.constant 0 : i32
    return %c0_i32, %c0_i32_0, %c0_i32_1 : i32, i32, i32
  }
  func.func @transform_8(%arg0: i32) -> (i32, i32, i32) {
    %c0_i32 = arith.constant 0 : i32
    %c0_i32_0 = arith.constant 0 : i32
    %c0_i32_1 = arith.constant 0 : i32
    %c0_i32_2 = arith.constant 0 : i32
    return %c0_i32, %c0_i32_0, %c0_i32_1 : i32, i32, i32
  }
  func.func @transform_9(%arg0: i32) -> (i32, i32, i32) {
    %c0_i32 = arith.constant 0 : i32
    %c0_i32_0 = arith.constant 0 : i32
    %c0_i32_1 = arith.constant 0 : i32
    %c0_i32_2 = arith.constant 0 : i32
    return %c0_i32, %c0_i32_0, %c0_i32_1 : i32, i32, i32
  }
  func.func @transform_10(%arg0: i32) -> (i32, i32, i32) {
    %c0_i32 = arith.constant 0 : i32
    %c0_i32_0 = arith.constant 0 : i32
    %c0_i32_1 = arith.constant 0 : i32
    %c0_i32_2 = arith.constant 0 : i32
    return %c0_i32, %c0_i32_0, %c0_i32_1 : i32, i32, i32
  }
  func.func @transform_11(%arg0: i32) -> (i32, i32, i32) {
    %c0_i32 = arith.constant 0 : i32
    %c0_i32_0 = arith.constant 0 : i32
    %c0_i32_1 = arith.constant 0 : i32
    %c0_i32_2 = arith.constant 0 : i32
    return %c0_i32, %c0_i32_0, %c0_i32_1 : i32, i32, i32
  }
  func.func @transform_12(%arg0: i32) -> (i32, i32) {
    %c0_i32 = arith.constant 0 : i32
    %c0_i32_0 = arith.constant 0 : i32
    %c0_i32_1 = arith.constant 0 : i32
    return %c0_i32, %c0_i32_0 : i32, i32
  }
  func.func @transform_13(%arg0: i32) -> (i32, i32, i32) {
    %c0_i32 = arith.constant 0 : i32
    %c0_i32_0 = arith.constant 0 : i32
    %c0_i32_1 = arith.constant 0 : i32
    return %c0_i32, %arg0, %c0_i32_0 : i32, i32, i32
  }
}

</mosaic_0001>

<bundles_post_ra>
// kernel: tpu_custom_call.1
= control target key start
LH: loop header
LB: loop body
LE: loop exit
PB: predicated region body
PF: predicated region fallthrough
CT: control target
= control target key end

     0   :  { %18 = vsyncpa [#allocation3], 0  ;;  %s1293_s0 = inlined_call_operand.hbm [shape: f32[8,256], index: 0, kind: input, shape index: {}]   ;;  %s1294_s1 = inlined_call_operand.hbm [shape: f32[256,128], index: 1, kind: input, shape index: {}]   ;;  %s1295_s2 = inlined_call_operand.vmem [shape: f32[1,128], index: 2, kind: input, shape index: {}]   ;;  %s1296_s3 = inlined_call_operand.hbm [shape: f32[128,128], index: 3, kind: input, shape index: {}]   ;;  %s1297_s4 = inlined_call_operand.hbm [shape: f32[1,128], index: 4, kind: input, shape index: {}]   ;;  %s1298_s5 = inlined_call_operand.hbm [shape: f32[128,128], index: 5, kind: input, shape index: {}]   ;;  %s1299_s6 = inlined_call_operand.vmem [shape: f32[1,128], index: 6, kind: input, shape index: {}]   ;;  %s1300_s7 = inlined_call_operand.hbm [shape: f32[1,128,128], index: 7, kind: input, shape index: {}]   ;;  %s1301_s8 = inlined_call_operand.vmem [shape: f32[1,1,128], index: 8, kind: input, shape index: {}]   ;;  %s1302_s9 = inlined_call_operand.hbm [shape: f32[1,128,128], index: 9, kind: input, shape index: {}]   ;;  %s1303_s10 = inlined_call_operand.vmem [shape: f32[1,1,128], index: 10, kind: input, shape index: {}]   ;;  %s1304_s11 = inlined_call_operand.hbm [shape: f32[5,128,256], index: 11, kind: input, shape index: {}]   ;;  %s1305_s12 = inlined_call_operand.vmem [shape: f32[1,256], index: 12, kind: input, shape index: {}]   ;;  %s1306_s13 = inlined_call_operand.hbm [shape: f32[5,8,256], index: 13, kind: output, shape index: {}]  }
   0x1   :  { %19 = vsyncpa [#allocation6], 0 }
   0x2   :  { %20 = vsyncpa [#allocation9], 0 }
   0x3   :  { %21 = vsyncpa [#allocation12], 0 }
   0x4   :  { %22 = vsyncpa [#allocation15], 0  ;;  %s39_s27 = sshll.u32 %s1294_s1, 4  ;;  %s40_s27 = int_to_ptr.hbm [resolvable:$true] %s39_s27 }
   0x5   :  { %23 = vsyncpa [#allocation4], 0  ;;  %s1123_s28 = smov [#allocation5]   ;;  %s68_s15 = sshll.u32 %s1297_s4, 4  ;;  %s69_s15 = int_to_ptr.hbm [resolvable:$true] %s68_s15 }
   0x6   :  { %s41_s29 = sshll.u32 %s1123_s28, 4  ;;  %s1124_s16 = smov 128   ;;  %s42_s29 = int_to_ptr.vmem [resolvable:$true] %s41_s29 }
   0x7   :  { %s1125_s17 = smov 8   ;;  %s1126_s18 = smov [#allocation8]  }
   0x8   :  { %47 = dma.hbm_to_vmem [thread:$0]  %s40_s27, 4096, %s42_s29, [#allocation6], %s1124_s16, %s1124_s16, %s1125_s17  }
   0x9   :  { %s70_s19 = sshll.u32 %s1126_s18, 4  ;;  %s93_s21 = sshll.u32 %s1300_s7, 4  ;;  %s71_s19 = int_to_ptr.vmem [resolvable:$true] %s70_s19  ;;  %s94_s21 = int_to_ptr.hbm [resolvable:$true] %s93_s21 }
   0xa   :  { %73 = dma.hbm_to_vmem [thread:$0]  %s69_s15, 16, %s71_s19, [#allocation9]  }
   0xb   :  { %s29_s4 = sshll.u32 %s1293_s0, 4  ;;  %s1127_s24 = smov [#allocation11]   ;;  %s30_s4 = int_to_ptr.hbm [resolvable:$true] %s29_s4 }
   0xc   :  { %s95_s25 = sshll.u32 %s1127_s24, 4  ;;  %s1128_s26 = smov [#allocation2]   ;;  %s96_s25 = int_to_ptr.vmem [resolvable:$true] %s95_s25 }
   0xd   :  { %101 = dma.hbm_to_vmem [thread:$0]  %s94_s21, 2048, %s96_s25, [#allocation12], %s1124_s16, %s1124_s16, %s1125_s17  }
   0xe   :  { %s31_s27 = sshll.u32 %s1128_s26, 4  ;;  %s54_s7 = sshll.u32 %s1296_s3, 4  ;;  %s32_s27 = int_to_ptr.vmem [resolvable:$true] %s31_s27  ;;  %s55_s7 = int_to_ptr.hbm [resolvable:$true] %s54_s7 }
   0xf   :  { %34 = dma.hbm_to_vmem [thread:$0]  %s30_s4, 256, %s32_s27, [#allocation3]  }
  0x10   :  { %s78_s0 = sshll.u32 %s1298_s5, 4  ;;  %s1129_s15 = smov [#allocation7]   ;;  %s79_s0 = int_to_ptr.hbm [resolvable:$true] %s78_s0 }
  0x11   :  { %s56_s18 = sshll.u32 %s1129_s15, 4  ;;  %s1130_s19 = smov [#allocation10]   ;;  %s57_s18 = int_to_ptr.vmem [resolvable:$true] %s56_s18 }
  0x12   :  { %62 = dma.hbm_to_vmem [thread:$0]  %s55_s7, 2048, %s57_s18, [#allocation6], %s1124_s16, %s1124_s16, %s1125_s17  }
  0x13   :  { %s80_s20 = sshll.u32 %s1130_s19, 4  ;;  %s108_s3 = sshll.u32 %s1302_s9, 4  ;;  %s81_s20 = int_to_ptr.vmem [resolvable:$true] %s80_s20  ;;  %s109_s3 = int_to_ptr.hbm [resolvable:$true] %s108_s3 }
  0x14   :  { %86 = dma.hbm_to_vmem [thread:$0]  %s79_s0, 2048, %s81_s20, [#allocation9], %s1124_s16, %s1124_s16, %s1125_s17  }
  0x15   :  { %s123_s23 = sshll.u32 %s1304_s11, 4  ;;  %s1131_s4 = smov [#allocation13]   ;;  %s124_s23 = int_to_ptr.hbm [resolvable:$true] %s123_s23 }
  0x16   :  { %s110_s24 = sshll.u32 %s1131_s4, 4  ;;  %s1132_s25 = smov [#allocation14]   ;;  %s111_s24 = int_to_ptr.vmem [resolvable:$true] %s110_s24 }
  0x17   :  { %116 = dma.hbm_to_vmem [thread:$0]  %s109_s3, 2048, %s111_s24, [#allocation12], %s1124_s16, %s1124_s16, %s1125_s17  }
  0x18   :  { %s125_s9 = sshll.u32 %s1132_s25, 4  ;;  %s1133_s26 = smov 256   ;;  %s126_s9 = int_to_ptr.vmem [resolvable:$true] %s125_s9 }
  0x19   :  { %s1134_s27 = smov 16  }
  0x1a   :  { %131 = dma.hbm_to_vmem [thread:$0]  %s124_s23, 20480, %s126_s9, [#allocation15], %s1133_s26, %s1133_s26, %s1134_s27  }
  0x1b   :  { %1111 = dma.done.wait [#allocation3], 256  }
  0x1c   :  { %1112 = vsyncadd [#allocation3], 4294967040 }
  0x1d   :  { %1113 = dma.done.wait [#allocation6], 6144  }
  0x1e   :  { %1114 = vsyncadd [#allocation6], 4294961152 }
  0x1f   :  { %1115 = dma.done.wait [#allocation9], 2064  }
  0x20   :  { %1116 = vsyncadd [#allocation9], 4294965232 }
  0x21   :  { %1117 = dma.done.wait [#allocation12], 4096  }
  0x22   :  { %1118 = vsyncadd [#allocation12], 4294963200 }
  0x23   :  { %1119 = dma.done.wait [#allocation15], 20480  }
  0x24   :  { %1120 = vsyncadd [#allocation15], 4294946816  ;;  %v183_v0 = vld [vmem:[#allocation5 + $0x78] sm:$0xff]  ;;  %v182_v1 = vld [vmem:[#allocation5 + $0x70] sm:$0xff]  ;;  %s1135_s21 = smov [#allocation16]   ;;  %s832_s23 = sshll.u32 %s1306_s13, 4  ;;  %s833_s23 = int_to_ptr.hbm [resolvable:$true] %s832_s23 }
  0x25   :  { %v199_v2 = vld [vmem:[#allocation5 + $0xf8] sm:$0xff]  ;;  %204 = vmatpush.msra.mxu0 %v183_v0  ;;  %v198_v3 = vld [vmem:[#allocation5 + $0xf0] sm:$0xff]  ;;  %v181_v4 = vld [vmem:[#allocation5 + $0x68] sm:$0xff]  ;;  %s830_s3 = sshll.u32 %s1135_s21, 4  ;;  %s831_s3 = int_to_ptr.vmem [resolvable:$true] %s830_s3 }
  0x26   :  { %224 = vmatpush.msra.mxu1 %v199_v2  ;;  %v197_v5 = vld [vmem:[#allocation5 + $0xe8] sm:$0xff]  ;;  %v180_v6 = vld [vmem:[#allocation5 + $0x60] sm:$0xff]  ;;  %v179_v8 = vld [vmem:[#allocation5 + $0x58] sm:$0xff] }
  0x27   :  { %205 = vmatpush.msra.mxu0 %v182_v1  ;;  %v196_v7 = vld [vmem:[#allocation5 + $0xe0] sm:$0xff]  ;;  %v195_v9 = vld [vmem:[#allocation5 + $0xd8] sm:$0xff]  ;;  %v178_v10 = vld [vmem:[#allocation5 + $0x50] sm:$0xff] }
  0x28   :  { %225 = vmatpush.msra.mxu1 %v198_v3  ;;  %v194_v11 = vld [vmem:[#allocation5 + $0xd0] sm:$0xff]  ;;  %v177_v12 = vld [vmem:[#allocation5 + $0x48] sm:$0xff]  ;;  %v260_v14 = vld [vmem:[#allocation7 + $0x78] sm:$0xff] }
  0x29   :  { %206 = vmatpush.msra.mxu0 %v181_v4  ;;  %v193_v13 = vld [vmem:[#allocation5 + $0xc8] sm:$0xff]  ;;  %v259_v15 = vld [vmem:[#allocation7 + $0x70] sm:$0xff]  ;;  %v176_v16 = vld [vmem:[#allocation5 + $0x40] sm:$0xff]  ;;  %265 = vmatpush.msra.mxu2 %v260_v14 }
  0x2a   :  { %226 = vmatpush.msra.mxu1 %v197_v5  ;;  %v192_v17 = vld [vmem:[#allocation5 + $0xc0] sm:$0xff]  ;;  %v175_v18 = vld [vmem:[#allocation5 + $0x38] sm:$0xff]  ;;  %v258_v19 = vld [vmem:[#allocation7 + $0x68] sm:$0xff] }
  0x2b   :  { %207 = vmatpush.msra.mxu0 %v180_v6  ;;  %v174_v20 = vld [vmem:[#allocation5 + $0x30] sm:$0xff]  ;;  %v191_v21 = vld [vmem:[#allocation5 + $0xb8] sm:$0xff]  ;;  %266 = vmatpush.msra.mxu2 %v259_v15  ;;  %v257_v22 = vld [vmem:[#allocation7 + $0x60] sm:$0xff] }
  0x2c   :  { %227 = vmatpush.msra.mxu1 %v196_v7  ;;  %v190_v23 = vld [vmem:[#allocation5 + $0xb0] sm:$0xff]  ;;  %v256_v24 = vld [vmem:[#allocation7 + $0x58] sm:$0xff]  ;;  %v173_v25 = vld [vmem:[#allocation5 + $0x28] sm:$0xff] }
  0x2d   :  { %208 = vmatpush.msra.mxu0 %v179_v8  ;;  %267 = vmatpush.msra.mxu2 %v258_v19  ;;  %v189_v26 = vld [vmem:[#allocation5 + $0xa8] sm:$0xff]  ;;  %v255_v27 = vld [vmem:[#allocation7 + $0x50] sm:$0xff]  ;;  %v172_v28 = vld [vmem:[#allocation5 + $0x20] sm:$0xff] }
  0x2e   :  { %228 = vmatpush.msra.mxu1 %v195_v9  ;;  %v188_v29 = vld [vmem:[#allocation5 + $0xa0] sm:$0xff]  ;;  %v254_v30 = vld [vmem:[#allocation7 + $0x48] sm:$0xff]  ;;  %v171_v31 = vld [vmem:[#allocation5 + $0x18] sm:$0xff] }
  0x2f   :  { %209 = vmatpush.msra.mxu0 %v178_v10  ;;  %268 = vmatpush.msra.mxu2 %v257_v22  ;;  %v187_v32 = vld [vmem:[#allocation5 + $0x98] sm:$0xff]  ;;  %v253_v33 = vld [vmem:[#allocation7 + $0x40] sm:$0xff]  ;;  %v170_v34 = vld [vmem:[#allocation5 + $0x10] sm:$0xff] }
  0x30   :  { %229 = vmatpush.msra.mxu1 %v194_v11  ;;  %v186_v35 = vld [vmem:[#allocation5 + $0x90] sm:$0xff]  ;;  %v252_v36 = vld [vmem:[#allocation7 + $0x38] sm:$0xff]  ;;  %v169_v37 = vld [vmem:[#allocation5 + $0x8] sm:$0xff] }
  0x31   :  { %210 = vmatpush.msra.mxu0 %v177_v12  ;;  %269 = vmatpush.msra.mxu2 %v256_v24  ;;  %v185_v38 = vld [vmem:[#allocation5 + $0x88] sm:$0xff]  ;;  %v251_v39 = vld [vmem:[#allocation7 + $0x30] sm:$0xff]  ;;  %v168_v40 = vld [vmem:[#allocation5] sm:$0xff] }
  0x32   :  { %230 = vmatpush.msra.mxu1 %v193_v13  ;;  %v184_v41 = vld [vmem:[#allocation5 + $0x80] sm:$0xff]  ;;  %v166_v42 = vld [vmem:[#allocation2] sm:$0xff]  ;;  %v167_v43 = vld [vmem:[#allocation2 + $0x8] sm:$0xff] }
  0x33   :  { %211 = vmatpush.msra.mxu0 %v176_v16  ;;  %270 = vmatpush.msra.mxu2 %v255_v27  ;;  %v250_v44 = vld [vmem:[#allocation7 + $0x28] sm:$0xff]  ;;  %v249_v45 = vld [vmem:[#allocation7 + $0x20] sm:$0xff]  ;;  %v248_v46 = vld [vmem:[#allocation7 + $0x18] sm:$0xff] }
  0x34   :  { %231 = vmatpush.msra.mxu1 %v192_v17  ;;  %v247_v47 = vld [vmem:[#allocation7 + $0x10] sm:$0xff]  ;;  %v246_v48 = vld [vmem:[#allocation7 + $0x8] sm:$0xff]  ;;  %v245_v49 = vld [vmem:[#allocation7] sm:$0xff] }
  0x35   :  { %212 = vmatpush.msra.mxu0 %v175_v18  ;;  %271 = vmatpush.msra.mxu2 %v254_v30  ;;  %v301_v50 = vld [vmem:[#allocation10 + $0x78] sm:$0xff]  ;;  %v300_v51 = vld [vmem:[#allocation10 + $0x70] sm:$0xff]  ;;  %v299_v52 = vld [vmem:[#allocation10 + $0x68] sm:$0xff] }
  0x36   :  { %232 = vmatpush.msra.mxu1 %v191_v21  ;;  %306 = vmatpush.msra.mxu3 %v301_v50  ;;  %v298_v53 = vld [vmem:[#allocation10 + $0x60] sm:$0xff]  ;;  %v297_v54 = vld [vmem:[#allocation10 + $0x58] sm:$0xff]  ;;  %v296_v55 = vld [vmem:[#allocation10 + $0x50] sm:$0xff] }
  0x37   :  { %213 = vmatpush.msra.mxu0 %v174_v20  ;;  %272 = vmatpush.msra.mxu2 %v253_v33  ;;  %v295_v56 = vld [vmem:[#allocation10 + $0x48] sm:$0xff]  ;;  %v294_v57 = vld [vmem:[#allocation10 + $0x40] sm:$0xff]  ;;  %v293_v58 = vld [vmem:[#allocation10 + $0x38] sm:$0xff] }
  0x38   :  { %233 = vmatpush.msra.mxu1 %v190_v23  ;;  %307 = vmatpush.msra.mxu3 %v300_v51  ;;  %v292_v59 = vld [vmem:[#allocation10 + $0x30] sm:$0xff]  ;;  %v862_v60 = vld [vmem:[%s1295_s2] ss:$0 sm:$0xff]  ;;  %v290_v3 = vld [vmem:[#allocation10 + $0x20] sm:$0xff] }
  0x39   :  { %214 = vmatpush.msra.mxu0 %v173_v25  ;;  %273 = vmatpush.msra.mxu2 %v252_v36  ;;  %v291_v61 = vld [vmem:[#allocation10 + $0x28] sm:$0xff]  ;;  %v289_v4 = vld [vmem:[#allocation10 + $0x18] sm:$0xff]  ;;  %v288_v5 = vld [vmem:[#allocation10 + $0x10] sm:$0xff] }
  0x3a   :  { %234 = vmatpush.msra.mxu1 %v189_v26  ;;  %308 = vmatpush.msra.mxu3 %v299_v52  ;;  %v287_v6 = vld [vmem:[#allocation10 + $0x8] sm:$0xff]  ;;  %v286_v7 = vld [vmem:[#allocation10] sm:$0xff]  ;;  %v341_v8 = vld [vmem:[#allocation11 + $0x78] sm:$0xff] }
  0x3b   :  { %215 = vmatpush.msra.mxu0 %v172_v28  ;;  %274 = vmatpush.msra.mxu2 %v251_v39  ;;  %v340_v9 = vld [vmem:[#allocation11 + $0x70] sm:$0xff]  ;;  %v339_v10 = vld [vmem:[#allocation11 + $0x68] sm:$0xff]  ;;  %v338_v11 = vld [vmem:[#allocation11 + $0x60] sm:$0xff] }
  0x3c   :  { %235 = vmatpush.msra.mxu1 %v188_v29  ;;  %309 = vmatpush.msra.mxu3 %v298_v53  ;;  %v337_v12 = vld [vmem:[#allocation11 + $0x58] sm:$0xff]  ;;  %v336_v13 = vld [vmem:[#allocation11 + $0x50] sm:$0xff]  ;;  %v335_v14 = vld [vmem:[#allocation11 + $0x48] sm:$0xff] }
  0x3d   :  { %216 = vmatpush.msra.mxu0 %v171_v31  ;;  %275 = vmatpush.msra.mxu2 %v250_v44  ;;  %v334_v15 = vld [vmem:[#allocation11 + $0x40] sm:$0xff]  ;;  %v333_v16 = vld [vmem:[#allocation11 + $0x38] sm:$0xff]  ;;  %v332_v17 = vld [vmem:[#allocation11 + $0x30] sm:$0xff] }
  0x3e   :  { %236 = vmatpush.msra.mxu1 %v187_v32  ;;  %310 = vmatpush.msra.mxu3 %v297_v54  ;;  %v331_v18 = vld [vmem:[#allocation11 + $0x28] sm:$0xff]  ;;  %v863_v19 = vld [vmem:[#allocation8] ss:$0 sm:$0xff]  ;;  %v330_v20 = vld [vmem:[#allocation11 + $0x20] sm:$0xff] }
  0x3f   :  { %217 = vmatpush.msra.mxu0 %v170_v34  ;;  %276 = vmatpush.msra.mxu2 %v249_v45  ;;  %v329_v22 = vld [vmem:[#allocation11 + $0x18] sm:$0xff]  ;;  %v328_v24 = vld [vmem:[#allocation11 + $0x10] sm:$0xff]  ;;  %v327_v26 = vld [vmem:[#allocation11 + $0x8] sm:$0xff] }
  0x40   :  { %237 = vmatpush.msra.mxu1 %v186_v35  ;;  %311 = vmatpush.msra.mxu3 %v296_v55  ;;  %v326_v27 = vld [vmem:[#allocation11] sm:$0xff]  ;;  %v382_v28 = vld [vmem:[#allocation13 + $0x78] sm:$0xff]  ;;  %v381_v29 = vld [vmem:[#allocation13 + $0x70] sm:$0xff] }
  0x41   :  { %218 = vmatpush.msra.mxu0 %v169_v37  ;;  %277 = vmatpush.msra.mxu2 %v248_v46  ;;  %v380_v30 = vld [vmem:[#allocation13 + $0x68] sm:$0xff]  ;;  %v379_v31 = vld [vmem:[#allocation13 + $0x60] sm:$0xff]  ;;  %v378_v32 = vld [vmem:[#allocation13 + $0x58] sm:$0xff] }
  0x42   :  { %238 = vmatpush.msra.mxu1 %v185_v38  ;;  %312 = vmatpush.msra.mxu3 %v295_v56  ;;  %v377_v33 = vld [vmem:[#allocation13 + $0x50] sm:$0xff]  ;;  %v376_v34 = vld [vmem:[#allocation13 + $0x48] sm:$0xff]  ;;  %v375_v35 = vld [vmem:[#allocation13 + $0x40] sm:$0xff] }
  0x43   :  { %219 = vmatpush.msra.mxu0 %v168_v40  ;;  %278 = vmatpush.msra.mxu2 %v247_v47  ;;  %v374_v36 = vld [vmem:[#allocation13 + $0x38] sm:$0xff]  ;;  %v373_v37 = vld [vmem:[#allocation13 + $0x30] sm:$0xff]  ;;  %v372_v38 = vld [vmem:[#allocation13 + $0x28] sm:$0xff] }
  0x44   :  { %239 = vmatpush.msra.mxu1 %v184_v41  ;;  %220 = vmatmul.f32.vlgmr.msra.gmra.mxu0 %v166_v42  ;;  %v864_v39 = vld [vmem:[%s1299_s6] ss:$0 sm:$0xff]  ;;  %v371_v42 = vld [vmem:[#allocation13 + $0x20] sm:$0xff]  ;;  %v369_v44 = vld [vmem:[#allocation13 + $0x10] sm:$0xff] }
  0x45   :  { %240 = vmatmul.f32.vlgmr.msra.gmra.mxu1 %v167_v43  ;;  %279 = vmatpush.msra.mxu2 %v246_v48  ;;  %v370_v43 = vld [vmem:[#allocation13 + $0x18] sm:$0xff]  ;;  %v368_v45 = vld [vmem:[#allocation13 + $0x8] sm:$0xff]  ;;  %v367_v46 = vld [vmem:[#allocation13] sm:$0xff] }
  0x46   :  { %313 = vmatpush.msra.mxu3 %v294_v57  ;;  %346 = vmatpush.msrb.mxu0 %v341_v8  ;;  %v438_v47 = vld [vmem:[#allocation14 + $0xf0] sm:$0xff]  ;;  %v439_v48 = vld [vmem:[#allocation14 + $0xf8] sm:$0xff]  ;;  %v437_v50 = vld [vmem:[#allocation14 + $0xe8] sm:$0xff] }
  0x47   :  { %280 = vmatpush.msra.mxu2 %v245_v49  ;;  %387 = vmatpush.msrb.mxu1 %v382_v28  ;;  %v436_v49 = vld [vmem:[#allocation14 + $0xe0] sm:$0xff]  ;;  %v434_v51 = vld [vmem:[#allocation14 + $0xd0] sm:$0xff]  ;;  %v435_v52 = vld [vmem:[#allocation14 + $0xd8] sm:$0xff] }
  0x48   :  { %314 = vmatpush.msra.mxu3 %v293_v58  ;;  %347 = vmatpush.msrb.mxu0 %v340_v9  ;;  %v521_v53 = vld [vmem:[#allocation14 + $0x1f0] sm:$0xff]  ;;  %v522_v54 = vld [vmem:[#allocation14 + $0x1f8] sm:$0xff]  ;;  %v432_v55 = vld [vmem:[#allocation14 + $0xc0] sm:$0xff] }
  0x49   :  { %388 = vmatpush.msrb.mxu1 %v381_v29  ;;  %446 = vmatpush.msrb.mxu2 %v438_v47  ;;  %v433_v56 = vld [vmem:[#allocation14 + $0xc8] sm:$0xff]  ;;  %v519_v57 = vld [vmem:[#allocation14 + $0x1e0] sm:$0xff]  ;;  %v430_v58 = vld [vmem:[#allocation14 + $0xb0] sm:$0xff] }
  0x4a   :  { %315 = vmatpush.msra.mxu3 %v292_v59  ;;  %348 = vmatpush.msrb.mxu0 %v339_v10  ;;  %v520_v59 = vld [vmem:[#allocation14 + $0x1e8] sm:$0xff]  ;;  %v424_v9 = vld [vmem:[#allocation14 + $0x80] sm:$0xff]  ;;  %v501_v28 = vld [vmem:[#allocation14 + $0x150] sm:$0xff] }
  0x4b   :  { %389 = vmatpush.msrb.mxu1 %v380_v30  ;;  %447 = vmatpush.msrb.mxu2 %v436_v49  ;;  %v512_v8 = vld [vmem:[#allocation14 + $0x1a8] sm:$0xff]  ;;  %v502_v29 = vld [vmem:[#allocation14 + $0x158] sm:$0xff] }
  0x4c   :  { %316 = vmatpush.msra.mxu3 %v291_v61  ;;  %349 = vmatpush.msrb.mxu0 %v338_v11  ;;  %v517_v61 = vld [vmem:[#allocation14 + $0x1d0] sm:$0xff]  ;;  %v425_v10 = vld [vmem:[#allocation14 + $0x88] sm:$0xff]  ;;  %v606_v47 = vld [vmem:[#allocation14 + $0x2f8] sm:$0xff] }
  0x4d   :  { %390 = vmatpush.msrb.mxu1 %v379_v31  ;;  %448 = vmatpush.msrb.mxu2 %v434_v51  ;;  %v509_v11 = vld [vmem:[#allocation14 + $0x190] sm:$0xff]  ;;  %v494_v51 = vld [vmem:[#allocation14 + $0x118] sm:$0xff] }
  0x4e   :  { %317 = vmatpush.msra.mxu3 %v290_v3  ;;  %350 = vmatpush.msrb.mxu0 %v337_v12  ;;  %v513_v3 = vld [vmem:[#allocation14 + $0x1b0] sm:$0xff]  ;;  %v510_v12 = vld [vmem:[#allocation14 + $0x198] sm:$0xff] }
  0x4f   :  { %391 = vmatpush.msrb.mxu1 %v378_v32  ;;  %449 = vmatpush.msrb.mxu2 %v432_v55  ;;  %v414_v31 = vld [vmem:[#allocation14 + $0x30] sm:$0xff]  ;;  %v415_v32 = vld [vmem:[#allocation14 + $0x38] sm:$0xff]  ;;  %v492_v55 = vld [vmem:[#allocation14 + $0x108] sm:$0xff] }
  0x50   :  { %318 = vmatpush.msra.mxu3 %v289_v4  ;;  %351 = vmatpush.msrb.mxu0 %v336_v13  ;;  %v514_v4 = vld [vmem:[#allocation14 + $0x1b8] sm:$0xff]  ;;  %v422_v13 = vld [vmem:[#allocation14 + $0x70] sm:$0xff] }
  0x51   :  { %392 = vmatpush.msrb.mxu1 %v377_v33  ;;  %450 = vmatpush.msrb.mxu2 %v430_v58  ;;  %v599_v58 = vld [vmem:[#allocation14 + $0x2c0] sm:$0xff] }
  0x52   :  { %319 = vmatpush.msra.mxu3 %v288_v5  ;;  %352 = vmatpush.msrb.mxu0 %v335_v14  ;;  %v426_v5 = vld [vmem:[#allocation14 + $0x90] sm:$0xff]  ;;  %v423_v14 = vld [vmem:[#allocation14 + $0x78] sm:$0xff] }
  0x53   :  { %393 = vmatpush.msrb.mxu1 %v376_v34  ;;  %v499_v34 = vld [vmem:[#allocation14 + $0x140] sm:$0xff] }
  0x54   :  { %320 = vmatpush.msra.mxu3 %v287_v6  ;;  %353 = vmatpush.msrb.mxu0 %v334_v15  ;;  %v427_v6 = vld [vmem:[#allocation14 + $0x98] sm:$0xff]  ;;  %v507_v15 = vld [vmem:[#allocation14 + $0x180] sm:$0xff] }
  0x55   :  { %394 = vmatpush.msrb.mxu1 %v375_v35  ;;  %v500_v35 = vld [vmem:[#allocation14 + $0x148] sm:$0xff] }
  0x56   :  { %321 = vmatpush.msra.mxu3 %v286_v7  ;;  %354 = vmatpush.msrb.mxu0 %v333_v16  ;;  %v511_v7 = vld [vmem:[#allocation14 + $0x1a0] sm:$0xff]  ;;  %v508_v16 = vld [vmem:[#allocation14 + $0x188] sm:$0xff] }
  0x57   :  { %395 = vmatpush.msrb.mxu1 %v374_v36  ;;  %v412_v36 = vld [vmem:[#allocation14 + $0x20] sm:$0xff] }
  0x58   :  { %355 = vmatpush.msrb.mxu0 %v332_v17  ;;  %466 = vmatpush.msrb.mxu3 %v439_v48  ;;  %v420_v17 = vld [vmem:[#allocation14 + $0x60] sm:$0xff]  ;;  %v493_v48 = vld [vmem:[#allocation14 + $0x110] sm:$0xff] }
  0x59   :  { %396 = vmatpush.msrb.mxu1 %v373_v37  ;;  %v413_v37 = vld [vmem:[#allocation14 + $0x28] sm:$0xff] }
  0x5a   :  { %356 = vmatpush.msrb.mxu0 %v331_v18  ;;  %467 = vmatpush.msrb.mxu3 %v437_v50  ;;  %v421_v18 = vld [vmem:[#allocation14 + $0x68] sm:$0xff]  ;;  %v603_v50 = vld [vmem:[#allocation14 + $0x2e0] sm:$0xff] }
  0x5b   :  { %397 = vmatpush.msrb.mxu1 %v372_v38  ;;  %v497_v38 = vld [vmem:[#allocation14 + $0x130] sm:$0xff] }
  0x5c   :  { %357 = vmatpush.msrb.mxu0 %v330_v20  ;;  %468 = vmatpush.msrb.mxu3 %v435_v52  ;;  %v506_v20 = vld [vmem:[#allocation14 + $0x178] sm:$0xff]  ;;  %v604_v52 = vld [vmem:[#allocation14 + $0x2e8] sm:$0xff] }
  0x5d   :  { %398 = vmatpush.msrb.mxu1 %v371_v42  ;;  %v495_v42 = vld [vmem:[#allocation14 + $0x120] sm:$0xff] }
  0x5e   :  { %358 = vmatpush.msrb.mxu0 %v329_v22  ;;  %469 = vmatpush.msrb.mxu3 %v433_v56  ;;  %v419_v22 = vld [vmem:[#allocation14 + $0x58] sm:$0xff] }
  0x5f   :  { %399 = vmatpush.msrb.mxu1 %v370_v43  ;;  %v496_v43 = vld [vmem:[#allocation14 + $0x128] sm:$0xff]  ;;  %v602_v56 = vld [vmem:[#allocation14 + $0x2d8] sm:$0xff] }
  0x60   :  { %359 = vmatpush.msrb.mxu0 %v328_v24  ;;  %v503_v24 = vld [vmem:[#allocation14 + $0x160] sm:$0xff] }
  0x61   :  { %400 = vmatpush.msrb.mxu1 %v369_v44  ;;  %v408_v44 = vld [vmem:[#allocation14] sm:$0xff] }
  0x62   :  { %360 = vmatpush.msrb.mxu0 %v327_v26  ;;  %v416_v26 = vld [vmem:[#allocation14 + $0x40] sm:$0xff] }
  0x63   :  { %401 = vmatpush.msrb.mxu1 %v368_v45  ;;  %v409_v45 = vld [vmem:[#allocation14 + $0x8] sm:$0xff] }
  0x64   :  { %361 = vmatpush.msrb.mxu0 %v326_v27  ;;  %v417_v27 = vld [vmem:[#allocation14 + $0x48] sm:$0xff] }
  0x65   :  { %402 = vmatpush.msrb.mxu1 %v367_v46  ;;  %v605_v46 = vld [vmem:[#allocation14 + $0x2f0] sm:$0xff] }
  0x66   :  { %529 = vmatpush.msra.mxu0 %v521_v53  ;;  %v491_v53 = vld [vmem:[#allocation14 + $0x100] sm:$0xff] }
  0x67   :  { %549 = vmatpush.msra.mxu1 %v522_v54  ;;  %v601_v54 = vld [vmem:[#allocation14 + $0x2d0] sm:$0xff] }
  0x68   :  { %530 = vmatpush.msra.mxu0 %v519_v57  ;;  %v689_v57 = vld [vmem:[#allocation14 + $0x3f0] sm:$0xff] }
  0x69   :  { %550 = vmatpush.msra.mxu1 %v520_v59  ;;  %v690_v59 = vld [vmem:[#allocation14 + $0x3f8] sm:$0xff] }
  0x6a   :  { %531 = vmatpush.msra.mxu0 %v517_v61  ;;  %v687_v61 = vld [vmem:[#allocation14 + $0x3e0] sm:$0xff] }
  0xc1   :  { %v221_v62 = vpop.f32.mrf.mxu0 }
  0xc2   :  { %v241_v63 = vpop.f32.mrf.mxu1  ;;  %v222_v0 = vadd.f32 %v862_v60, %v221_v62  ;;  %v431_v60 = vld [vmem:[#allocation14 + $0xb8] sm:$0xff] }
  0xc3   :  { %v518_v62 = vld [vmem:[#allocation14 + $0x1d8] sm:$0xff]  ;;  %470 = vmatpush.msrb.mxu3 %v431_v60  ;;  %v600_v60 = vld [vmem:[#allocation14 + $0x2c8] sm:$0xff] }
  0xc4   :  { %v242_v1 = vadd.f32 %v241_v63, %v222_v0  ;;  %v515_v63 = vld [vmem:[#allocation14 + $0x1c0] sm:$0xff]  ;;  %v516_v0 = vld [vmem:[#allocation14 + $0x1c8] sm:$0xff]  ;;  %551 = vmatpush.msra.mxu1 %v518_v62  ;;  %v597_v62 = vld [vmem:[#allocation14 + $0x2b0] sm:$0xff] }
  0xc5   :  { %532 = vmatpush.msra.mxu0 %v515_v63  ;;  %v688_v63 = vld [vmem:[#allocation14 + $0x3e8] sm:$0xff] }
  0xc6   :  { %867 = vtanh.f32 %v242_v1  ;;  %v428_v1 = vld [vmem:[#allocation14 + $0xa0] sm:$0xff]  ;;  %552 = vmatpush.msra.mxu1 %v516_v0  ;;  %v598_v0 = vld [vmem:[#allocation14 + $0x2b8] sm:$0xff] }
  0xc7   :  { %451 = vmatpush.msrb.mxu2 %v428_v1  ;;  %533 = vmatpush.msra.mxu0 %v513_v3  ;;  %v685_v1 = vld [vmem:[#allocation14 + $0x3d0] sm:$0xff]  ;;  %v686_v3 = vld [vmem:[#allocation14 + $0x3d8] sm:$0xff] }
  0xc8   :  { %553 = vmatpush.msra.mxu1 %v514_v4  ;;  %v596_v4 = vld [vmem:[#allocation14 + $0x2a8] sm:$0xff] }
  0xc9   :  { %452 = vmatpush.msrb.mxu2 %v426_v5  ;;  %534 = vmatpush.msra.mxu0 %v511_v7  ;;  %v683_v5 = vld [vmem:[#allocation14 + $0x3c0] sm:$0xff]  ;;  %v684_v7 = vld [vmem:[#allocation14 + $0x3c8] sm:$0xff] }
  0xca   :  { %554 = vmatpush.msra.mxu1 %v512_v8  ;;  %v594_v8 = vld [vmem:[#allocation14 + $0x298] sm:$0xff] }
  0xcb   :  { %453 = vmatpush.msrb.mxu2 %v424_v9  ;;  %535 = vmatpush.msra.mxu0 %v509_v11  ;;  %v681_v9 = vld [vmem:[#allocation14 + $0x3b0] sm:$0xff]  ;;  %v682_v11 = vld [vmem:[#allocation14 + $0x3b8] sm:$0xff] }
  0xcc   :  { %v868_v2 = vpop.eup %867  ;;  %555 = vmatpush.msra.mxu1 %v510_v12  ;;  %v592_v12 = vld [vmem:[#allocation14 + $0x288] sm:$0xff] }
  0xcd   :  { %281 = vmatmul.f32.vlgmr.msra.gmra.mxu2 %v868_v2  ;;  %v429_v2 = vld [vmem:[#allocation14 + $0xa8] sm:$0xff]  ;;  %536 = vmatpush.msra.mxu0 %v507_v15 }
  0xce   :  { %471 = vmatpush.msrb.mxu3 %v429_v2  ;;  %454 = vmatpush.msrb.mxu2 %v422_v13  ;;  %v595_v2 = vld [vmem:[#allocation14 + $0x2a0] sm:$0xff]  ;;  %v680_v15 = vld [vmem:[#allocation14 + $0x3a8] sm:$0xff] }
  0xcf   :  { %556 = vmatpush.msra.mxu1 %v508_v16  ;;  %v679_v13 = vld [vmem:[#allocation14 + $0x3a0] sm:$0xff]  ;;  %v590_v16 = vld [vmem:[#allocation14 + $0x278] sm:$0xff] }
  0xd0   :  { %472 = vmatpush.msrb.mxu3 %v427_v6  ;;  %455 = vmatpush.msrb.mxu2 %v420_v17  ;;  %v593_v6 = vld [vmem:[#allocation14 + $0x290] sm:$0xff] }
  0xd1   :  { %557 = vmatpush.msra.mxu1 %v506_v20  ;;  %v677_v17 = vld [vmem:[#allocation14 + $0x390] sm:$0xff]  ;;  %v588_v20 = vld [vmem:[#allocation14 + $0x268] sm:$0xff] }
  0xd2   :  { %473 = vmatpush.msrb.mxu3 %v425_v10  ;;  %v591_v10 = vld [vmem:[#allocation14 + $0x280] sm:$0xff] }
  0xd4   :  { %474 = vmatpush.msrb.mxu3 %v423_v14  ;;  %v589_v14 = vld [vmem:[#allocation14 + $0x270] sm:$0xff] }
  0xd6   :  { %475 = vmatpush.msrb.mxu3 %v421_v18  ;;  %v587_v18 = vld [vmem:[#allocation14 + $0x260] sm:$0xff] }
  0xd8   :  { %476 = vmatpush.msrb.mxu3 %v419_v22  ;;  %v586_v22 = vld [vmem:[#allocation14 + $0x258] sm:$0xff] }
  0xda   :  { %477 = vmatpush.msrb.mxu3 %v417_v27  ;;  %v581_v27 = vld [vmem:[#allocation14 + $0x230] sm:$0xff] }
  0xdc   :  { %478 = vmatpush.msrb.mxu3 %v415_v32  ;;  %v580_v32 = vld [vmem:[#allocation14 + $0x228] sm:$0xff] }
  0xde   :  { %479 = vmatpush.msrb.mxu3 %v413_v37  ;;  %v669_v37 = vld [vmem:[#allocation14 + $0x350] sm:$0xff] }
 0x150   :  { %v282_v21 = vpop.f32.mrf.mxu2 }
 0x151   :  { %v283_v23 = vadd.f32 %v863_v19, %v282_v21  ;;  %v505_v19 = vld [vmem:[#allocation14 + $0x170] sm:$0xff] }
 0x152   :  { %v418_v21 = vld [vmem:[#allocation14 + $0x50] sm:$0xff]  ;;  %537 = vmatpush.msra.mxu0 %v505_v19  ;;  %v678_v19 = vld [vmem:[#allocation14 + $0x398] sm:$0xff] }
 0x153   :  { %869 = vtanh.f32 %v283_v23  ;;  %v865_v23 = vld [vmem:[%s1301_s8] ss:$0 sm:$0xff]  ;;  %456 = vmatpush.msrb.mxu2 %v418_v21  ;;  %v585_v21 = vld [vmem:[#allocation14 + $0x250] sm:$0xff] }
 0x154   :  { %538 = vmatpush.msra.mxu0 %v503_v24  ;;  %v584_v24 = vld [vmem:[#allocation14 + $0x248] sm:$0xff] }
 0x155   :  { %457 = vmatpush.msrb.mxu2 %v416_v26  ;;  %v676_v26 = vld [vmem:[#allocation14 + $0x388] sm:$0xff] }
 0x156   :  { %539 = vmatpush.msra.mxu0 %v501_v28  ;;  %v582_v28 = vld [vmem:[#allocation14 + $0x238] sm:$0xff] }
 0x157   :  { %458 = vmatpush.msrb.mxu2 %v414_v31  ;;  %v579_v31 = vld [vmem:[#allocation14 + $0x220] sm:$0xff] }
 0x158   :  { %540 = vmatpush.msra.mxu0 %v499_v34  ;;  %v672_v34 = vld [vmem:[#allocation14 + $0x368] sm:$0xff] }
 0x159   :  { %v870_v25 = vpop.eup %869  ;;  %459 = vmatpush.msrb.mxu2 %v412_v36  ;;  %v578_v36 = vld [vmem:[#allocation14 + $0x218] sm:$0xff] }
 0x15a   :  { %322 = vmatmul.f32.vlgmr.msra.gmra.mxu3 %v870_v25  ;;  %v504_v25 = vld [vmem:[#allocation14 + $0x168] sm:$0xff]  ;;  %541 = vmatpush.msra.mxu0 %v497_v38  ;;  %v670_v38 = vld [vmem:[#allocation14 + $0x358] sm:$0xff] }
 0x15b   :  { %558 = vmatpush.msra.mxu1 %v504_v25  ;;  %v675_v25 = vld [vmem:[#allocation14 + $0x380] sm:$0xff] }
 0x15c   :  { %542 = vmatpush.msra.mxu0 %v495_v42  ;;  %v668_v42 = vld [vmem:[#allocation14 + $0x348] sm:$0xff] }
 0x15d   :  { %559 = vmatpush.msra.mxu1 %v502_v29  ;;  %v673_v29 = vld [vmem:[#allocation14 + $0x370] sm:$0xff] }
 0x15e   :  { %543 = vmatpush.msra.mxu0 %v493_v48  ;;  %v662_v48 = vld [vmem:[#allocation14 + $0x318] sm:$0xff] }
 0x15f   :  { %560 = vmatpush.msra.mxu1 %v500_v35  ;;  %v577_v35 = vld [vmem:[#allocation14 + $0x210] sm:$0xff] }
 0x160   :  { %544 = vmatpush.msra.mxu0 %v491_v53 }
 0x1dd   :  { %v323_v40 = vpop.f32.mrf.mxu3 }
 0x1de   :  { %v324_v41 = vadd.f32 %v864_v39, %v323_v40  ;;  %v498_v39 = vld [vmem:[#allocation14 + $0x138] sm:$0xff]  ;;  %v410_v40 = vld [vmem:[#allocation14 + $0x10] sm:$0xff] }
 0x1df   :  { %561 = vmatpush.msra.mxu1 %v498_v39  ;;  %460 = vmatpush.msrb.mxu2 %v410_v40  ;;  %v575_v39 = vld [vmem:[#allocation14 + $0x200] sm:$0xff]  ;;  %v576_v40 = vld [vmem:[#allocation14 + $0x208] sm:$0xff] }
 0x1e0   :  { %362 = vmatmul.f32.vlgmr.msrb.gmra.mxu0 %v324_v41  ;;  %v411_v41 = vld [vmem:[#allocation14 + $0x18] sm:$0xff] }
 0x1e1   :  { %480 = vmatpush.msrb.mxu3 %v411_v41  ;;  %562 = vmatpush.msra.mxu1 %v496_v43  ;;  %v667_v41 = vld [vmem:[#allocation14 + $0x340] sm:$0xff]  ;;  %v665_v43 = vld [vmem:[#allocation14 + $0x330] sm:$0xff] }
 0x1e2   :  { %461 = vmatpush.msrb.mxu2 %v408_v44  ;;  %697 = vmatpush.msrb.mxu0 %v689_v57  ;;  %v666_v44 = vld [vmem:[#allocation14 + $0x338] sm:$0xff]  ;;  %v771_v57 = vld [vmem:[#allocation14 + $0x4e0] sm:$0xff] }
 0x1e3   :  { %481 = vmatpush.msrb.mxu3 %v409_v45  ;;  %563 = vmatpush.msra.mxu1 %v494_v51  ;;  %v663_v45 = vld [vmem:[#allocation14 + $0x320] sm:$0xff]  ;;  %v866_v51 = vld [vmem:[%s1303_s10] ss:$0 sm:$0xff] }
 0x1e4   :  { %613 = vmatpush.msra.mxu2 %v605_v46  ;;  %698 = vmatpush.msrb.mxu0 %v687_v61  ;;  %v664_v46 = vld [vmem:[#allocation14 + $0x328] sm:$0xff]  ;;  %v767_v61 = vld [vmem:[#allocation14 + $0x4c0] sm:$0xff] }
 0x1e5   :  { %633 = vmatpush.msra.mxu3 %v606_v47  ;;  %564 = vmatpush.msra.mxu1 %v492_v55  ;;  %v661_v47 = vld [vmem:[#allocation14 + $0x310] sm:$0xff] }
 0x1e6   :  { %614 = vmatpush.msra.mxu2 %v603_v50  ;;  %699 = vmatpush.msrb.mxu0 %v685_v1  ;;  %v660_v50 = vld [vmem:[#allocation14 + $0x308] sm:$0xff]  ;;  %v773_v55 = vld [vmem:[#allocation14 + $0x4f0] sm:$0xff]  ;;  %v763_v1 = vld [vmem:[#allocation14 + $0x4a0] sm:$0xff] }
 0x1e7   :  { %634 = vmatpush.msra.mxu3 %v604_v52 }
 0x1e8   :  { %615 = vmatpush.msra.mxu2 %v601_v54  ;;  %700 = vmatpush.msrb.mxu0 %v683_v5  ;;  %v759_v5 = vld [vmem:[#allocation14 + $0x480] sm:$0xff] }
 0x1e9   :  { %635 = vmatpush.msra.mxu3 %v602_v56  ;;  %v774_v56 = vld [vmem:[#allocation14 + $0x4f8] sm:$0xff] }
 0x1ea   :  { %616 = vmatpush.msra.mxu2 %v599_v58  ;;  %701 = vmatpush.msrb.mxu0 %v681_v9  ;;  %v772_v58 = vld [vmem:[#allocation14 + $0x4e8] sm:$0xff]  ;;  %v755_v9 = vld [vmem:[#allocation14 + $0x460] sm:$0xff] }
 0x1eb   :  { %636 = vmatpush.msra.mxu3 %v600_v60  ;;  %v770_v60 = vld [vmem:[#allocation14 + $0x4d8] sm:$0xff] }
 0x1ec   :  { %617 = vmatpush.msra.mxu2 %v597_v62  ;;  %702 = vmatpush.msrb.mxu0 %v679_v13  ;;  %v768_v62 = vld [vmem:[#allocation14 + $0x4c8] sm:$0xff]  ;;  %v751_v13 = vld [vmem:[#allocation14 + $0x440] sm:$0xff] }
 0x1ed   :  { %637 = vmatpush.msra.mxu3 %v598_v0  ;;  %v766_v0 = vld [vmem:[#allocation14 + $0x4b8] sm:$0xff] }
 0x1ee   :  { %618 = vmatpush.msra.mxu2 %v595_v2  ;;  %703 = vmatpush.msrb.mxu0 %v677_v17  ;;  %v764_v2 = vld [vmem:[#allocation14 + $0x4a8] sm:$0xff]  ;;  %v747_v17 = vld [vmem:[#allocation14 + $0x420] sm:$0xff] }
 0x1ef   :  { %638 = vmatpush.msra.mxu3 %v596_v4  ;;  %v762_v4 = vld [vmem:[#allocation14 + $0x498] sm:$0xff] }
 0x1f0   :  { %619 = vmatpush.msra.mxu2 %v593_v6  ;;  %704 = vmatpush.msrb.mxu0 %v675_v25  ;;  %v760_v6 = vld [vmem:[#allocation14 + $0x488] sm:$0xff] }
 0x1f1   :  { %639 = vmatpush.msra.mxu3 %v594_v8  ;;  %v758_v8 = vld [vmem:[#allocation14 + $0x478] sm:$0xff] }
 0x1f2   :  { %620 = vmatpush.msra.mxu2 %v591_v10  ;;  %705 = vmatpush.msrb.mxu0 %v673_v29  ;;  %v756_v10 = vld [vmem:[#allocation14 + $0x468] sm:$0xff] }
 0x1f3   :  { %640 = vmatpush.msra.mxu3 %v592_v12  ;;  %v754_v12 = vld [vmem:[#allocation14 + $0x458] sm:$0xff] }
 0x1f4   :  { %621 = vmatpush.msra.mxu2 %v589_v14  ;;  %v752_v14 = vld [vmem:[#allocation14 + $0x448] sm:$0xff] }
 0x1f5   :  { %641 = vmatpush.msra.mxu3 %v590_v16  ;;  %v750_v16 = vld [vmem:[#allocation14 + $0x438] sm:$0xff] }
 0x1f6   :  { %622 = vmatpush.msra.mxu2 %v587_v18  ;;  %v748_v18 = vld [vmem:[#allocation14 + $0x428] sm:$0xff] }
 0x1f7   :  { %642 = vmatpush.msra.mxu3 %v588_v20  ;;  %v746_v20 = vld [vmem:[#allocation14 + $0x418] sm:$0xff] }
 0x1f8   :  { %623 = vmatpush.msra.mxu2 %v585_v21  ;;  %v743_v21 = vld [vmem:[#allocation14 + $0x400] sm:$0xff] }
 0x1f9   :  { %643 = vmatpush.msra.mxu3 %v586_v22  ;;  %v744_v22 = vld [vmem:[#allocation14 + $0x408] sm:$0xff] }
 0x1fb   :  { %644 = vmatpush.msra.mxu3 %v584_v24 }
 0x1fd   :  { %645 = vmatpush.msra.mxu3 %v582_v28 }
 0x1ff   :  { %646 = vmatpush.msra.mxu3 %v580_v32 }
 0x201   :  { %647 = vmatpush.msra.mxu3 %v578_v36 }
 0x203   :  { %648 = vmatpush.msra.mxu3 %v576_v40  ;;  %v607_v40 = vld [vmem:[%s1305_s12] sm:$0x3] }
 0x25d   :  { %v363_v30 = vpop.f32.mrf.mxu0 }
 0x25e   :  { %v364_v33 = vadd.f32 %v865_v23, %v363_v30  ;;  %v583_v23 = vld [vmem:[#allocation14 + $0x240] sm:$0xff]  ;;  %v674_v30 = vld [vmem:[#allocation14 + $0x378] sm:$0xff] }
 0x25f   :  { %624 = vmatpush.msra.mxu2 %v583_v23  ;;  %v523_v23 = vld [vmem:[%s1305_s12] sm:$0x3] }
 0x260   :  { %871 = vtanh.f32 %v364_v33  ;;  %v671_v33 = vld [vmem:[#allocation14 + $0x360] sm:$0xff]  ;;  %v525_v24 = vperm.slane %v523_v23, 0  ;;  %v526_v25 = vperm.slane %v523_v23, 1 }
 0x261   :  { %625 = vmatpush.msra.mxu2 %v581_v27  ;;  %706 = vmatpush.msrb.mxu0 %v671_v33  ;;  %v691_v33 = vld [vmem:[%s1305_s12] sm:$0x3] }
 0x263   :  { %626 = vmatpush.msra.mxu2 %v579_v31  ;;  %707 = vmatpush.msrb.mxu0 %v669_v37 }
 0x265   :  { %627 = vmatpush.msra.mxu2 %v577_v35  ;;  %708 = vmatpush.msrb.mxu0 %v667_v41 }
 0x266   :  { %v872_v49 = vpop.eup %871 }
 0x267   :  { %403 = vmatmul.f32.vlgmr.msrb.gmra.mxu1 %v872_v49  ;;  %628 = vmatpush.msra.mxu2 %v575_v39  ;;  %v659_v49 = vld [vmem:[#allocation14 + $0x300] sm:$0xff]  ;;  %v694_v39 = vperm.slane %v691_v33, 1 }
 0x268   :  { %717 = vmatpush.msrb.mxu1 %v690_v59  ;;  %709 = vmatpush.msrb.mxu0 %v665_v43  ;;  %v769_v59 = vld [vmem:[#allocation14 + $0x4d0] sm:$0xff] }
 0x26a   :  { %718 = vmatpush.msrb.mxu1 %v688_v63  ;;  %710 = vmatpush.msrb.mxu0 %v663_v45  ;;  %v765_v63 = vld [vmem:[#allocation14 + $0x4b0] sm:$0xff] }
 0x26c   :  { %719 = vmatpush.msrb.mxu1 %v686_v3  ;;  %711 = vmatpush.msrb.mxu0 %v661_v47  ;;  %v761_v3 = vld [vmem:[#allocation14 + $0x490] sm:$0xff]  ;;  %v609_v47 = vperm.slane %v607_v40, 0 }
 0x26e   :  { %720 = vmatpush.msrb.mxu1 %v684_v7  ;;  %712 = vmatpush.msrb.mxu0 %v659_v49  ;;  %v757_v7 = vld [vmem:[#allocation14 + $0x470] sm:$0xff] }
 0x270   :  { %721 = vmatpush.msrb.mxu1 %v682_v11  ;;  %v753_v11 = vld [vmem:[#allocation14 + $0x450] sm:$0xff] }
 0x272   :  { %722 = vmatpush.msrb.mxu1 %v680_v15  ;;  %v749_v15 = vld [vmem:[#allocation14 + $0x430] sm:$0xff] }
 0x274   :  { %723 = vmatpush.msrb.mxu1 %v678_v19  ;;  %v745_v19 = vld [vmem:[#allocation14 + $0x410] sm:$0xff] }
 0x276   :  { %724 = vmatpush.msrb.mxu1 %v676_v26  ;;  %v440_v26 = vld [vmem:[%s1305_s12] sm:$0x3] }
 0x277   :  { %v442_v31 = vperm.slane %v440_v26, 0  ;;  %v443_v32 = vperm.slane %v440_v26, 1 }
 0x278   :  { %725 = vmatpush.msrb.mxu1 %v674_v30 }
 0x27a   :  { %726 = vmatpush.msrb.mxu1 %v672_v34 }
 0x27c   :  { %727 = vmatpush.msrb.mxu1 %v670_v38  ;;  %v693_v38 = vperm.slane %v691_v33, 0 }
 0x27e   :  { %728 = vmatpush.msrb.mxu1 %v668_v42 }
 0x280   :  { %729 = vmatpush.msrb.mxu1 %v666_v44 }
 0x282   :  { %730 = vmatpush.msrb.mxu1 %v664_v46 }
 0x284   :  { %731 = vmatpush.msrb.mxu1 %v662_v48  ;;  %v610_v48 = vperm.slane %v607_v40, 1 }
 0x286   :  { %732 = vmatpush.msrb.mxu1 %v660_v50 }
 0x2e4   :  { %v404_v52 = vpop.f32.mrf.mxu1 }
 0x2e5   :  { %v405_v53 = vadd.f32 %v866_v51, %v404_v52 }
 0x2e7   :  { %873 = vtanh.f32 %v405_v53 }
 0x2ed   :  { %v1260_v54 = vpop.eup %873 }
 0x2ee   :  { %462 = vmatmul.f32.vlgmr.msrb.gmra.mxu2 %v1260_v54  ;;  %482 = vmatmul.f32.vlgmr.msrb.gmra.mxu3 %v1260_v54 }
 0x2ef   :  { %545 = vmatmul.f32.vlgmr.msra.gmra.mxu0 %v1260_v54  ;;  %565 = vmatmul.f32.vlgmr.msra.gmra.mxu1 %v1260_v54 }
 0x2f0   :  { %781 = vmatpush.msrb.mxu2 %v773_v55  ;;  %801 = vmatpush.msrb.mxu3 %v774_v56 }
 0x2f2   :  { %782 = vmatpush.msrb.mxu2 %v771_v57  ;;  %802 = vmatpush.msrb.mxu3 %v772_v58 }
 0x2f4   :  { %783 = vmatpush.msrb.mxu2 %v769_v59  ;;  %803 = vmatpush.msrb.mxu3 %v770_v60  ;;  %v775_v59 = vld [vmem:[%s1305_s12] sm:$0x3] }
 0x2f5   :  { %v777_v60 = vperm.slane %v775_v59, 0 }
 0x2f6   :  { %784 = vmatpush.msrb.mxu2 %v767_v61  ;;  %804 = vmatpush.msrb.mxu3 %v768_v62  ;;  %v778_v61 = vperm.slane %v775_v59, 1 }
 0x2f7   :  { %629 = vmatmul.f32.vlgmr.msra.gmra.mxu2 %v1260_v54  ;;  %649 = vmatmul.f32.vlgmr.msra.gmra.mxu3 %v1260_v54 }
 0x2f8   :  { %713 = vmatmul.f32.vlgmr.msrb.gmra.mxu0 %v1260_v54  ;;  %733 = vmatmul.f32.vlgmr.msrb.gmra.mxu1 %v1260_v54 }
 0x2f9   :  { %785 = vmatpush.msrb.mxu2 %v765_v63  ;;  %805 = vmatpush.msrb.mxu3 %v766_v0 }
 0x2fb   :  { %786 = vmatpush.msrb.mxu2 %v763_v1  ;;  %806 = vmatpush.msrb.mxu3 %v764_v2 }
 0x2fd   :  { %787 = vmatpush.msrb.mxu2 %v761_v3  ;;  %807 = vmatpush.msrb.mxu3 %v762_v4 }
 0x2ff   :  { %788 = vmatpush.msrb.mxu2 %v759_v5  ;;  %808 = vmatpush.msrb.mxu3 %v760_v6 }
 0x301   :  { %789 = vmatpush.msrb.mxu2 %v757_v7  ;;  %809 = vmatpush.msrb.mxu3 %v758_v8 }
 0x303   :  { %790 = vmatpush.msrb.mxu2 %v755_v9  ;;  %810 = vmatpush.msrb.mxu3 %v756_v10 }
 0x305   :  { %791 = vmatpush.msrb.mxu2 %v753_v11  ;;  %811 = vmatpush.msrb.mxu3 %v754_v12 }
 0x307   :  { %792 = vmatpush.msrb.mxu2 %v751_v13  ;;  %812 = vmatpush.msrb.mxu3 %v752_v14 }
 0x309   :  { %793 = vmatpush.msrb.mxu2 %v749_v15  ;;  %813 = vmatpush.msrb.mxu3 %v750_v16 }
 0x30b   :  { %794 = vmatpush.msrb.mxu2 %v747_v17  ;;  %814 = vmatpush.msrb.mxu3 %v748_v18 }
 0x30d   :  { %795 = vmatpush.msrb.mxu2 %v745_v19  ;;  %815 = vmatpush.msrb.mxu3 %v746_v20 }
 0x30f   :  { %796 = vmatpush.msrb.mxu2 %v743_v21  ;;  %816 = vmatpush.msrb.mxu3 %v744_v22 }
 0x310   :  { %797 = vmatmul.f32.vlgmr.msrb.gmra.mxu2 %v1260_v54  ;;  %817 = vmatmul.f32.vlgmr.msrb.gmra.mxu3 %v1260_v54 }
 0x36c   :  { %v546_v27 = vpop.f32.mrf.mxu0  ;;  %v566_v28 = vpop.f32.mrf.mxu1 }
 0x36d   :  { %v547_v29 = vadd.f32 %v546_v27, %v525_v24  ;;  %v567_v30 = vadd.f32 %v566_v28, %v526_v25 }
 0x36f   :  { %875 = vtanh.f32 %v547_v29 }
 0x370   :  { %877 = vtanh.f32 %v567_v30 }
 0x371   :  { %v463_v34 = vpop.f32.mrf.mxu2  ;;  %v483_v35 = vpop.f32.mrf.mxu3 }
 0x372   :  { %v464_v36 = vadd.f32 %v463_v34, %v442_v31  ;;  %v484_v37 = vadd.f32 %v483_v35, %v443_v32 }
 0x374   :  { %879 = vtanh.f32 %v464_v36 }
 0x375   :  { %v876_v41 = vpop.eup %875  ;;  %881 = vtanh.f32 %v484_v37  ;;  %v714_v42 = vpop.f32.mrf.mxu0 }
 0x376   :  { %v734_v43 = vpop.f32.mrf.mxu1  ;;  %v878_v44 = vpop.eup %877  ;;  %572 = vst [vmem:[#allocation16 + $0x10] sm:$0xff] %v876_v41  ;;  %v715_v45 = vadd.f32 %v714_v42, %v693_v38 }
 0x377   :  { %v735_v46 = vadd.f32 %v734_v43, %v694_v39  ;;  %573 = vst [vmem:[#allocation16 + $0x18] sm:$0xff] %v878_v44 }
 0x378   :  { %883 = vtanh.f32 %v715_v45 }
 0x379   :  { %885 = vtanh.f32 %v735_v46 }
 0x37a   :  { %v880_v49 = vpop.eup %879  ;;  %v630_v50 = vpop.f32.mrf.mxu2 }
 0x37b   :  { %v650_v51 = vpop.f32.mrf.mxu3  ;;  %v882_v52 = vpop.eup %881  ;;  %488 = vst [vmem:[#allocation16] sm:$0xff] %v880_v49  ;;  %v631_v53 = vadd.f32 %v630_v50, %v609_v47 }
 0x37c   :  { %v651_v54 = vadd.f32 %v650_v51, %v610_v48  ;;  %489 = vst [vmem:[#allocation16 + $0x8] sm:$0xff] %v882_v52 }
 0x37d   :  { %887 = vtanh.f32 %v631_v53 }
 0x37e   :  { %v884_v55 = vpop.eup %883  ;;  %889 = vtanh.f32 %v651_v54 }
 0x37f   :  { %v886_v56 = vpop.eup %885  ;;  %740 = vst [vmem:[#allocation16 + $0x30] sm:$0xff] %v884_v55 }
 0x380   :  { %741 = vst [vmem:[#allocation16 + $0x38] sm:$0xff] %v886_v56 }
 0x383   :  { %v888_v57 = vpop.eup %887 }
 0x384   :  { %v890_v58 = vpop.eup %889  ;;  %656 = vst [vmem:[#allocation16 + $0x20] sm:$0xff] %v888_v57 }
 0x385   :  { %657 = vst [vmem:[#allocation16 + $0x28] sm:$0xff] %v890_v58 }
 0x393   :  { %v798_v62 = vpop.f32.mrf.mxu2  ;;  %v818_v63 = vpop.f32.mrf.mxu3 }
 0x394   :  { %v799_v0 = vadd.f32 %v798_v62, %v777_v60  ;;  %v819_v1 = vadd.f32 %v818_v63, %v778_v61 }
 0x396   :  { %891 = vtanh.f32 %v799_v0 }
 0x397   :  { %893 = vtanh.f32 %v819_v1 }
 0x39c   :  { %v892_v2 = vpop.eup %891 }
 0x39d   :  { %v894_v3 = vpop.eup %893  ;;  %824 = vst [vmem:[#allocation16 + $0x40] sm:$0xff] %v892_v2 }
 0x39e   :  { %825 = vst [vmem:[#allocation16 + $0x48] sm:$0xff] %v894_v3 }
 0x39f   :  { %838 = dma.vmem_to_hbm [thread:$0]  %s831_s3, 1280, %s833_s23, [#allocation4], %s1133_s26, %s1133_s26, %s1134_s27  }
 0x3a0   :  { %1121 = dma.done.wait [#allocation4], 1280  }
 0x3a1   :  { %1122 = vsyncadd [#allocation4], 4294966016 }
 0x3a2   :  { %843 = vsyncpa [#allocation3], 1 }
 0x3a3   :  { %844 = vsyncpa [#allocation6], 1 }
 0x3a4   :  { %845 = vsyncpa [#allocation9], 1 }
 0x3a5   :  { %846 = vsyncpa [#allocation12], 1 }
 0x3a6   :  { %847 = vsyncpa [#allocation15], 1 }
 0x3a7   :  { %848 = vsyncpa [#allocation4], 1 }

</bundles_post_ra>
